<compile_context>
chip_gen: v7x
topology: tpu7x:2x2x1
jax: 0.10.0
libtpu: 0.0.40
codegen_flags: <defaults>
</compile_context>

<pallas_src>
import functools

import jax
import jax.numpy as jnp
from jax import lax
from jax.experimental import pallas as pl
from jax.experimental.pallas import tpu as pltpu

_BN_EPS = 1e-5
_LANES = 128


def _round_up(x, m):
    return (x + m - 1) // m * m


# ------------------------------ fused kernel -------------------------------

def _resblock_kernel(*refs, stride, ksize, pad, oh, ow, nb, sscin, cpad, use_wid):
    """Whole ResBlock for `nb` images, fully resident in VMEM.

    refs (inputs):
      xr_ref  : [nb, Hq, Wq, S*S*cin_pad] bf16  phase-packed, spatially padded x
      w1_ref  : [A*A, S*S*cin_pad, cpad]  bf16  conv1 grouped weights (BN1 folded,
                                                zero rows for out-of-group phases)
      w2p_ref : [3, 2*cpad, cpad]         bf16  conv2 (ki=0,ki=1) tap pairs per kj
      w2s_ref : [3, cpad, cpad]           bf16  conv2 ki=2 taps per kj
      wid_ref : [S*S*cin_pad, cpad]       bf16  1x1 projection / eye (only if use_wid)
      bias_ref: [2, cpad]                 f32   row0 = b1, row1 = b2 (+ skip-BN bias)
    outputs / scratch:
      o_ref   : [nb, oh, ow, cpad]        bf16  lane-dense channel-padded output
      mid_ref : [nb, oh+1, ow+16, 2*cpad] bf16  double-stored conv1 activation
    """
    if use_wid:
        xr_ref, w1_ref, w2p_ref, w2s_ref, wid_ref, bias_ref, o_ref, mid_ref = refs
    else:
        xr_ref, w1_ref, w2p_ref, w2s_ref, bias_ref, o_ref, mid_ref = refs
        wid_ref = None

    S, K = stride, ksize
    A = (K - 1) // S + 1                 # in-kernel spatial offsets per axis
    m = nb * oh * ow

    b1 = bias_ref[0:1, :]                # [1, cpad] f32
    b2 = bias_ref[1:2, :]

    # ---- conv1: A*A grouped MXU dots (K = S*S*cin_pad each), f32 accumulation ----
    acc = None
    for ai in range(A):
        for aj in range(A):
            slab = xr_ref[:, ai:ai + oh, aj:aj + ow, :]          # [nb, oh, ow, sscin]
            part = jnp.dot(slab.reshape(m, sscin), w1_ref[ai * A + aj],
                           preferred_element_type=jnp.float32)
            acc = part if acc is None else acc + part
    mid = jnp.maximum(acc + b1, 0.0).astype(jnp.bfloat16)        # single f32->bf16 cast
    mid = mid.reshape(nb, oh, ow, cpad)

    # ---- stash mid twice (row-pair packing) in the bf16 VMEM scratch -----------
    # Border-only zeroing; redone every grid step (scratch persists across steps).
    zrow = jnp.zeros((nb, 1, ow + 16, 2 * cpad), jnp.bfloat16)
    zcol = jnp.zeros((nb, oh + 1, 8, 2 * cpad), jnp.bfloat16)
    mid_ref[:, 0:1, :, :] = zrow
    mid_ref[:, oh:oh + 1, :, :] = zrow
    mid_ref[:, :, 0:8, :] = zcol
    mid_ref[:, :, ow + 8:ow + 16, :] = zcol
    mid_ref[:, 1:1 + oh, 8:8 + ow, 0:cpad] = mid                 # slot 0: mid_pad[i-1]
    mid_ref[:, 0:oh, 8:8 + ow, cpad:2 * cpad] = mid              # slot 1: mid_pad[i]

    # ---- skip connection -> conv2 accumulator ----------------------------------
    a0 = pad // S
    slab = xr_ref[:, a0:a0 + oh, a0:a0 + ow, :]
    if use_wid:
        # 1x1 projection (or eye for small-cin identity): phase-masked weight rows.
        acc = jnp.dot(slab.reshape(m, sscin), wid_ref[...],
                      preferred_element_type=jnp.float32)
    else:
        # Identity skip with cin_pad == cout_pad: no matmul needed (trace-time bypass).
        acc = slab.reshape(m, sscin).astype(jnp.float32)

    # ---- conv2: 3 paired dots (K=2*cpad) + 3 single dots (K=cpad) ---------------
    for kj in range(K):
        pair = mid_ref[:, 0:oh, kj + 7:kj + 7 + ow, :]           # taps (ki=0, ki=1)
        acc = acc + jnp.dot(pair.reshape(m, 2 * cpad), w2p_ref[kj],
                            preferred_element_type=jnp.float32)
        last = mid_ref[:, 1:1 + oh, kj + 7:kj + 7 + ow, cpad:2 * cpad]   # tap ki=2
        acc = acc + jnp.dot(last.reshape(m, cpad), w2s_ref[kj],
                            preferred_element_type=jnp.float32)

    out = jnp.maximum(acc + b2, 0.0)
    o_ref[...] = out.reshape(nb, oh, ow, cpad).astype(o_ref.dtype)


# ----------------------------- host-side wrapper ----------------------------

def _prep_input(x_nhwc, stride, pad, ksize, cin_pad):
    """bf16 cast -> spatial pad -> lane-packed stride-phase split.

    xr[n, a, b, (pi*S+pj)*cin_pad + c] == x_padded[n, a*S+pi, b*S+pj, c]
    Same bytes as a plain phase split (no duplication); every conv tap group in the
    kernel becomes a unit-stride, full-minor slice.  Stride 1 needs no transpose.
    """
    N, H, W, C = x_nhwc.shape
    S = stride
    OH = (H + 2 * pad - ksize) // S + 1
    OW = (W + 2 * pad - ksize) // S + 1
    A = (ksize - 1) // S + 1
    Hq = max((H + 2 * pad + S - 1) // S, OH + A - 1)
    Wq = max((W + 2 * pad + S - 1) // S, OW + A - 1)
    xb = x_nhwc.astype(jnp.bfloat16)                         # cast BEFORE pad/transpose
    xp = jnp.pad(xb, ((0, 0),
                      (pad, Hq * S - H - pad),
                      (pad, Wq * S - W - pad),
                      (0, cin_pad - C)))
    if S == 1:
        xr = xp                                              # no relayout for stride 1
    else:
        xr = xp.reshape(N, Hq, S, Wq, S, cin_pad)
        xr = jnp.transpose(xr, (0, 1, 3, 2, 4, 5)).reshape(N, Hq, Wq, S * S * cin_pad)
    return xr, OH, OW, Hq, Wq


def resblock_forward(x_nchw, prep):
    """PyTorch-style NCHW in / NCHW out forward of ResBlock."""
    x = jnp.transpose(x_nchw, (0, 2, 3, 1))                  # NCHW -> NHWC
    N, H, W, C = x.shape
    assert C == prep["cin"], (C, prep["cin"])
    S, K, pad = prep["stride"], prep["ksize"], prep["pad"]
    cin_pad, cpad, sscin, A = prep["cin_pad"], prep["cout_pad"], prep["sscin"], prep["A"]

    xr, OH, OW, Hq, Wq = _prep_input(x, S, pad, K, cin_pad)

    # Images per grid step: fold into the matmul M dim, but keep >=2 grid steps
    # (pipelining depth / both TensorCores on v7x) when the batch allows it.
    # NOTE: OH*OW multiples of 8 keep the in-kernel reshapes layout-free.
    nb = 1
    for cand in (8, 4, 2):
        if N % cand == 0 and cand * OH * OW <= 1024 and N // cand >= 2:
            nb = cand
            break

    in_specs = [
        pl.BlockSpec((nb, Hq, Wq, sscin), lambda n: (n, 0, 0, 0)),
        pl.BlockSpec((A * A, sscin, cpad), lambda n: (0, 0, 0)),
        pl.BlockSpec((K, 2 * cpad, cpad), lambda n: (0, 0, 0)),
        pl.BlockSpec((K, cpad, cpad), lambda n: (0, 0, 0)),
    ]
    args = [xr, prep["w1g"], prep["w2p"], prep["w2s"]]
    if prep["use_wid"]:
        in_specs.append(pl.BlockSpec((sscin, cpad), lambda n: (0, 0)))
        args.append(prep["wid"])
    else:
        assert S == 1 and sscin == cpad
    in_specs.append(pl.BlockSpec((2, cpad), lambda n: (0, 0)))
    args.append(prep["bias"])

    kernel = functools.partial(
        _resblock_kernel, stride=S, ksize=K, pad=pad, oh=OH, ow=OW,
        nb=nb, sscin=sscin, cpad=cpad, use_wid=prep["use_wid"])

    out = pl.pallas_call(
        kernel,
        grid=(N // nb,),
        in_specs=in_specs,
        out_specs=pl.BlockSpec((nb, OH, OW, cpad), lambda n: (n, 0, 0, 0)),
        out_shape=jax.ShapeDtypeStruct((N, OH, OW, cpad), jnp.bfloat16),
        scratch_shapes=[pltpu.VMEM((nb, OH + 1, OW + 16, 2 * cpad), jnp.bfloat16)],
        compiler_params=pltpu.CompilerParams(dimension_semantics=("parallel",)),
    )(*args)

    # A real pipeline would consume the channel-padded bf16 NHWC slab directly.
    y = out[:, :, :, :prep["cout"]].astype(jnp.float32)
    return jnp.transpose(y, (0, 3, 1, 2))                    # NHWC -> NCHW


# --------------------- parameters (deterministic) & prep --------------------

def _init_bn(key, c):
    kg, kb = jax.random.split(key)
    gamma = 1.0 + 0.1 * jax.random.normal(kg, (c,), jnp.float32)
    beta = 0.1 * jax.random.normal(kb, (c,), jnp.float32)
    running_mean = jnp.zeros((c,), jnp.float32)
    running_var = jnp.ones((c,), jnp.float32)
    scale = gamma / jnp.sqrt(running_var + _BN_EPS)          # eval-mode BN fold
    bias = beta - running_mean * scale
    return scale, bias


def init_resblock(key, cin, cout, stride):
    k = jax.random.split(key, 6)
    p = {"stride": stride, "cin": cin, "cout": cout}
    p["conv1_w"] = 0.1 * jax.random.normal(k[0], (3, 3, cin, cout), jnp.float32)
    p["bn1_scale"], p["bn1_bias"] = _init_bn(k[1], cout)
    p["conv2_w"] = 0.1 * jax.random.normal(k[2], (3, 3, cout, cout), jnp.float32)
    p["bn2_scale"], p["bn2_bias"] = _init_bn(k[3], cout)
    if stride != 1 or cin != cout:
        p["ident_w"] = 0.1 * jax.random.normal(k[4], (1, 1, cin, cout), jnp.float32)
        p["bnid_scale"], p["bnid_bias"] = _init_bn(k[5], cout)
    else:
        p["ident_w"] = None
    return p


def prepare_resblock(p):
    """One-time host prep: fold BN scales, build grouped/paired weight layouts."""
    K, pad = 3, 1
    cin, cout, S = p["cin"], p["cout"], p["stride"]
    cin_pad = _round_up(cin, 8)
    cout_pad = _round_up(cout, _LANES)
    A = (K - 1) // S + 1
    sscin = S * S * cin_pad
    identity = p["ident_w"] is None
    bypass_skip = identity and (cin_pad == cout_pad)

    w1f = p["conv1_w"] * p["bn1_scale"]                       # [K,K,cin,cout] f32
    w2f = p["conv2_w"] * p["bn2_scale"]

    # conv1 grouped weights: group (ai,aj) holds taps (ki,kj)=(ai*S+pi, aj*S+pj);
    # rows of phases not forming a valid tap stay zero (their lanes carry data of
    # other taps -> zero weight makes their contribution exactly zero).
    w1g = jnp.zeros((A * A, sscin, cout_pad), jnp.float32)
    for ki in range(K):
        for kj in range(K):
            ai, pi = ki // S, ki % S
            aj, pj = kj // S, kj % S
            r0 = (pi * S + pj) * cin_pad
            w1g = w1g.at[ai * A + aj, r0:r0 + cin, :cout].set(w1f[ki, kj])

    # conv2: (ki=0,ki=1) pairs (K=2*cout_pad) and ki=2 singles (K=cout_pad), per kj.
    w2p = jnp.zeros((K, 2 * cout_pad, cout_pad), jnp.float32)
    w2s = jnp.zeros((K, cout_pad, cout_pad), jnp.float32)
    for kj in range(K):
        w2p = w2p.at[kj, 0:cout, :cout].set(w2f[0, kj])
        w2p = w2p.at[kj, cout_pad:cout_pad + cout, :cout].set(w2f[1, kj])
        w2s = w2s.at[kj, 0:cout, :cout].set(w2f[2, kj])

    if bypass_skip:
        wid = None
        bid = jnp.zeros((cout,), jnp.float32)
    else:
        if not identity:
            wid_core = p["ident_w"][0, 0] * p["bnid_scale"]   # [cin, cout]
            bid = p["bnid_bias"]
        else:
            # Small-cin identity fallback: exact bf16 eye matmul (lane widening).
            wid_core = jnp.eye(cin, cout, dtype=jnp.float32)
            bid = jnp.zeros((cout,), jnp.float32)
        wid = jnp.zeros((sscin, cout_pad), jnp.float32)
        ph = (pad % S) * S + (pad % S)
        wid = wid.at[ph * cin_pad:ph * cin_pad + cin, :cout].set(wid_core)
        wid = wid.astype(jnp.bfloat16)

    def padc(v):
        return jnp.pad(v, (0, cout_pad - v.shape[0]))

    bias = jnp.stack([padc(p["bn1_bias"]),
                      padc(p["bn2_bias"] + bid)]).astype(jnp.float32)

    return {"stride": S, "ksize": K, "pad": pad, "cin": cin, "cout": cout,
            "cin_pad": cin_pad, "cout_pad": cout_pad, "sscin": sscin, "A": A,
            "use_wid": not bypass_skip,
            "w1g": w1g.astype(jnp.bfloat16),
            "w2p": w2p.astype(jnp.bfloat16),
            "w2s": w2s.astype(jnp.bfloat16),
            "wid": wid, "bias": bias}


# ------------------------- pure-JAX reference (check) ------------------------

def resblock_reference(x_nchw, p):
    f32 = jnp.float32

    def conv(inp, w, stride, pad):
        return lax.conv_general_dilated(
            inp, w, (stride, stride), [(pad, pad), (pad, pad)],
            dimension_numbers=("NHWC", "HWIO", "NHWC"),
            precision=lax.Precision.HIGHEST)

    S = p["stride"]
    x = jnp.transpose(x_nchw, (0, 2, 3, 1)).astype(f32)
    xb = x.astype(jnp.bfloat16).astype(f32)                        # match bf16 operands
    w1 = (p["conv1_w"] * p["bn1_scale"]).astype(jnp.bfloat16).astype(f32)
    w2 = (p["conv2_w"] * p["bn2_scale"]).astype(jnp.bfloat16).astype(f32)

    mid = jnp.maximum(conv(xb, w1, S, 1) + p["bn1_bias"], 0.0)
    midb = mid.astype(jnp.bfloat16).astype(f32)
    if p["ident_w"] is not None:
        wid = (p["ident_w"] * p["bnid_scale"]).astype(jnp.bfloat16).astype(f32)
        ident = conv(xb, wid, S, 0) + p["bnid_bias"]
    else:
        ident = xb
    out = jnp.maximum(conv(midb, w2, 1, 1) + p["bn2_bias"] + ident, 0.0)
    return jnp.transpose(out, (0, 3, 1, 2))


# ----------------------------------- main -----------------------------------

if __name__ == "__main__":
    root = jax.random.PRNGKey(0)
    kp1, kp2, kx1, kx2 = jax.random.split(root, 4)

    # Case 1: downsampling ResBlock with 1x1 projection skip (cin=4 -> cout=8, stride=2).
    params1 = init_resblock(kp1, cin=4, cout=8, stride=2)
    prep1 = prepare_resblock(params1)
    x1 = jax.random.normal(kx1, (2, 4, 16, 16), dtype=jnp.float32)

    # Case 2: identity-skip ResBlock (cin=cout=8, stride=1), batch=4 to exercise
    # the multi-image M-blocking (2 images per grid step, grid of 2).
    params2 = init_resblock(kp2, cin=8, cout=8, stride=1)
    prep2 = prepare_resblock(params2)
    x2 = jax.random.normal(kx2, (4, 8, 16, 16), dtype=jnp.float32)

    y1 = jax.jit(lambda x: resblock_forward(x, prep1))(x1)
    y2 = jax.jit(lambda x: resblock_forward(x, prep2))(x2)
    y1, y2 = jax.block_until_ready((y1, y2))

    r1 = resblock_reference(x1, params1)
    r2 = resblock_reference(x2, params2)

    assert y1.shape == (2, 8, 8, 8), y1.shape
    assert y2.shape == (4, 8, 16, 16), y2.shape
    assert bool(jnp.all(jnp.isfinite(y1))) and bool(jnp.all(jnp.isfinite(y2)))
    # bf16 output rounding (~0.4% rel) + accumulation-order differences.
    assert bool(jnp.allclose(y1, r1, rtol=2e-2, atol=2e-2)), float(jnp.max(jnp.abs(y1 - r1)))
    assert bool(jnp.allclose(y2, r2, rtol=2e-2, atol=2e-2)), float(jnp.max(jnp.abs(y2 - r2)))
    print("KERNEL_OK")
</pallas_src>

<mosaic_0001>
module attributes {stable_mosaic.version = 11 : i64} {
  func.func @_resblock_kernel(%arg0: i32, %arg1: memref<1x9x9x32xbf16, #tpu.memory_space<vmem>>, %arg2: memref<4x32x128xbf16, #tpu.memory_space<vmem>>, %arg3: memref<3x256x128xbf16, #tpu.memory_space<vmem>>, %arg4: memref<3x128x128xbf16, #tpu.memory_space<vmem>>, %arg5: memref<32x128xbf16, #tpu.memory_space<vmem>>, %arg6: memref<2x128xf32, #tpu.memory_space<vmem>>, %arg7: memref<1x8x8x128xbf16, #tpu.memory_space<vmem>>, %arg8: memref<1x9x24x256xbf16, #tpu.memory_space<vmem>>) attributes {dimension_semantics = [#tpu.dimension_semantics<parallel>], iteration_bounds = array<i64: 2>, scalar_prefetch = 0 : i64, scratch_operands = 1 : i64, tpu.core_type = #tpu.core_type<tc>, window_params = [{transform_indices = @transform_0, window_bounds = array<i64: 1, 9, 9, 32>}, {pipeline_mode = #tpu.pipeline_mode<synchronous>, transform_indices = @transform_1, window_bounds = array<i64: 4, 32, 128>}, {pipeline_mode = #tpu.pipeline_mode<synchronous>, transform_indices = @transform_2, window_bounds = array<i64: 3, 256, 128>}, {pipeline_mode = #tpu.pipeline_mode<synchronous>, transform_indices = @transform_3, window_bounds = array<i64: 3, 128, 128>}, {pipeline_mode = #tpu.pipeline_mode<synchronous>, transform_indices = @transform_4, window_bounds = array<i64: 32, 128>}, {pipeline_mode = #tpu.pipeline_mode<synchronous>, transform_indices = @transform_5, window_bounds = array<i64: 2, 128>}, {transform_indices = @transform_6, window_bounds = array<i64: 1, 8, 8, 128>}]} {
    %c0 = arith.constant 0 : index
    %c0_0 = arith.constant 0 : index
    %0 = vector.load %arg6[%c0, %c0_0] : memref<2x128xf32, #tpu.memory_space<vmem>>, vector<1x128xf32>
    %c1 = arith.constant 1 : index
    %c0_1 = arith.constant 0 : index
    %1 = vector.load %arg6[%c1, %c0_1] : memref<2x128xf32, #tpu.memory_space<vmem>>, vector<1x128xf32>
    %c0_2 = arith.constant 0 : index
    %c0_3 = arith.constant 0 : index
    %c0_4 = arith.constant 0 : index
    %c0_5 = arith.constant 0 : index
    %2 = vector.load %arg1[%c0_2, %c0_3, %c0_4, %c0_5] : memref<1x9x9x32xbf16, #tpu.memory_space<vmem>>, vector<1x8x8x32xbf16>
    %3 = vector.shape_cast %2 : vector<1x8x8x32xbf16> to vector<64x32xbf16>
    %c0_6 = arith.constant 0 : index
    %c0_7 = arith.constant 0 : index
    %c0_8 = arith.constant 0 : index
    %4 = vector.load %arg2[%c0_6, %c0_7, %c0_8] : memref<4x32x128xbf16, #tpu.memory_space<vmem>>, vector<1x32x128xbf16>
    %5 = vector.shape_cast %4 : vector<1x32x128xbf16> to vector<32x128xbf16>
    %cst = arith.constant dense<0.000000e+00> : vector<64x128xf32>
    %6 = tpu.matmul %3, %5, %cst {dimension_numbers = #tpu.dot_dimension_numbers<[1], [0], [0], [1], [0, 0, 1, 1], [], []>} : vector<64x32xbf16>, vector<32x128xbf16>, vector<64x128xf32> -> vector<64x128xf32>
    %c0_9 = arith.constant 0 : index
    %c0_10 = arith.constant 0 : index
    %c1_11 = arith.constant 1 : index
    %c0_12 = arith.constant 0 : index
    %7 = vector.load %arg1[%c0_9, %c0_10, %c1_11, %c0_12] : memref<1x9x9x32xbf16, #tpu.memory_space<vmem>>, vector<1x8x8x32xbf16>
    %8 = vector.shape_cast %7 : vector<1x8x8x32xbf16> to vector<64x32xbf16>
    %c1_13 = arith.constant 1 : index
    %c0_14 = arith.constant 0 : index
    %c0_15 = arith.constant 0 : index
    %9 = vector.load %arg2[%c1_13, %c0_14, %c0_15] : memref<4x32x128xbf16, #tpu.memory_space<vmem>>, vector<1x32x128xbf16>
    %10 = vector.shape_cast %9 : vector<1x32x128xbf16> to vector<32x128xbf16>
    %cst_16 = arith.constant dense<0.000000e+00> : vector<64x128xf32>
    %11 = tpu.matmul %8, %10, %cst_16 {dimension_numbers = #tpu.dot_dimension_numbers<[1], [0], [0], [1], [0, 0, 1, 1], [], []>} : vector<64x32xbf16>, vector<32x128xbf16>, vector<64x128xf32> -> vector<64x128xf32>
    %12 = arith.addf %6, %11 : vector<64x128xf32>
    %c0_17 = arith.constant 0 : index
    %c1_18 = arith.constant 1 : index
    %c0_19 = arith.constant 0 : index
    %c0_20 = arith.constant 0 : index
    %13 = vector.load %arg1[%c0_17, %c1_18, %c0_19, %c0_20] : memref<1x9x9x32xbf16, #tpu.memory_space<vmem>>, vector<1x8x8x32xbf16>
    %14 = vector.shape_cast %13 : vector<1x8x8x32xbf16> to vector<64x32xbf16>
    %c2 = arith.constant 2 : index
    %c0_21 = arith.constant 0 : index
    %c0_22 = arith.constant 0 : index
    %15 = vector.load %arg2[%c2, %c0_21, %c0_22] : memref<4x32x128xbf16, #tpu.memory_space<vmem>>, vector<1x32x128xbf16>
    %16 = vector.shape_cast %15 : vector<1x32x128xbf16> to vector<32x128xbf16>
    %cst_23 = arith.constant dense<0.000000e+00> : vector<64x128xf32>
    %17 = tpu.matmul %14, %16, %cst_23 {dimension_numbers = #tpu.dot_dimension_numbers<[1], [0], [0], [1], [0, 0, 1, 1], [], []>} : vector<64x32xbf16>, vector<32x128xbf16>, vector<64x128xf32> -> vector<64x128xf32>
    %18 = arith.addf %12, %17 : vector<64x128xf32>
    %c0_24 = arith.constant 0 : index
    %c1_25 = arith.constant 1 : index
    %c1_26 = arith.constant 1 : index
    %c0_27 = arith.constant 0 : index
    %19 = vector.load %arg1[%c0_24, %c1_25, %c1_26, %c0_27] : memref<1x9x9x32xbf16, #tpu.memory_space<vmem>>, vector<1x8x8x32xbf16>
    %20 = vector.shape_cast %19 : vector<1x8x8x32xbf16> to vector<64x32xbf16>
    %c3 = arith.constant 3 : index
    %c0_28 = arith.constant 0 : index
    %c0_29 = arith.constant 0 : index
    %21 = vector.load %arg2[%c3, %c0_28, %c0_29] : memref<4x32x128xbf16, #tpu.memory_space<vmem>>, vector<1x32x128xbf16>
    %22 = vector.shape_cast %21 : vector<1x32x128xbf16> to vector<32x128xbf16>
    %cst_30 = arith.constant dense<0.000000e+00> : vector<64x128xf32>
    %23 = tpu.matmul %20, %22, %cst_30 {dimension_numbers = #tpu.dot_dimension_numbers<[1], [0], [0], [1], [0, 0, 1, 1], [], []>} : vector<64x32xbf16>, vector<32x128xbf16>, vector<64x128xf32> -> vector<64x128xf32>
    %24 = arith.addf %18, %23 : vector<64x128xf32>
    %25 = vector.broadcast %0 : vector<1x128xf32> to vector<64x128xf32>
    %26 = arith.addf %24, %25 : vector<64x128xf32>
    %cst_31 = arith.constant 0.000000e+00 : f32
    %27 = vector.broadcast %cst_31 : f32 to vector<64x128xf32>
    %28 = arith.maximumf %26, %27 : vector<64x128xf32>
    %29 = arith.truncf %28 : vector<64x128xf32> to vector<64x128xbf16>
    %30 = vector.shape_cast %29 : vector<64x128xbf16> to vector<1x8x8x128xbf16>
    %cst_32 = arith.constant 0.000000e+00 : bf16
    %31 = vector.broadcast %cst_32 : bf16 to vector<1x1x24x256xbf16>
    %cst_33 = arith.constant 0.000000e+00 : bf16
    %32 = vector.broadcast %cst_33 : bf16 to vector<1x9x8x256xbf16>
    %c0_34 = arith.constant 0 : index
    %c0_35 = arith.constant 0 : index
    %c0_36 = arith.constant 0 : index
    %c0_37 = arith.constant 0 : index
    %33 = vector.load %arg8[%c0_34, %c0_35, %c0_36, %c0_37] : memref<1x9x24x256xbf16, #tpu.memory_space<vmem>>, vector<1x1x24x256xbf16>
    tpu.vector_store %arg8[%c0_34, %c0_35, %c0_36, %c0_37], %31 {strides = array<i32>} : memref<1x9x24x256xbf16, #tpu.memory_space<vmem>>, vector<1x1x24x256xbf16>,
    %c0_38 = arith.constant 0 : index
    %c8 = arith.constant 8 : index
    %c0_39 = arith.constant 0 : index
    %c0_40 = arith.constant 0 : index
    %34 = vector.load %arg8[%c0_38, %c8, %c0_39, %c0_40] : memref<1x9x24x256xbf16, #tpu.memory_space<vmem>>, vector<1x1x24x256xbf16>
    tpu.vector_store %arg8[%c0_38, %c8, %c0_39, %c0_40], %31 {strides = array<i32>} : memref<1x9x24x256xbf16, #tpu.memory_space<vmem>>, vector<1x1x24x256xbf16>,
    %c0_41 = arith.constant 0 : index
    %c0_42 = arith.constant 0 : index
    %c0_43 = arith.constant 0 : index
    %c0_44 = arith.constant 0 : index
    %35 = vector.load %arg8[%c0_41, %c0_42, %c0_43, %c0_44] : memref<1x9x24x256xbf16, #tpu.memory_space<vmem>>, vector<1x9x8x256xbf16>
    tpu.vector_store %arg8[%c0_41, %c0_42, %c0_43, %c0_44], %32 {strides = array<i32>} : memref<1x9x24x256xbf16, #tpu.memory_space<vmem>>, vector<1x9x8x256xbf16>,
    %c0_45 = arith.constant 0 : index
    %c0_46 = arith.constant 0 : index
    %c16 = arith.constant 16 : index
    %c0_47 = arith.constant 0 : index
    %36 = vector.load %arg8[%c0_45, %c0_46, %c16, %c0_47] : memref<1x9x24x256xbf16, #tpu.memory_space<vmem>>, vector<1x9x8x256xbf16>
    tpu.vector_store %arg8[%c0_45, %c0_46, %c16, %c0_47], %32 {strides = array<i32>} : memref<1x9x24x256xbf16, #tpu.memory_space<vmem>>, vector<1x9x8x256xbf16>,
    %c0_48 = arith.constant 0 : index
    %c1_49 = arith.constant 1 : index
    %c8_50 = arith.constant 8 : index
    %c0_51 = arith.constant 0 : index
    %37 = vector.load %arg8[%c0_48, %c1_49, %c8_50, %c0_51] : memref<1x9x24x256xbf16, #tpu.memory_space<vmem>>, vector<1x8x8x128xbf16>
    tpu.vector_store %arg8[%c0_48, %c1_49, %c8_50, %c0_51], %30 {strides = array<i32>} : memref<1x9x24x256xbf16, #tpu.memory_space<vmem>>, vector<1x8x8x128xbf16>,
    %c0_52 = arith.constant 0 : index
    %c0_53 = arith.constant 0 : index
    %c8_54 = arith.constant 8 : index
    %c128 = arith.constant 128 : index
    %38 = vector.load %arg8[%c0_52, %c0_53, %c8_54, %c128] : memref<1x9x24x256xbf16, #tpu.memory_space<vmem>>, vector<1x8x8x128xbf16>
    tpu.vector_store %arg8[%c0_52, %c0_53, %c8_54, %c128], %30 {strides = array<i32>} : memref<1x9x24x256xbf16, #tpu.memory_space<vmem>>, vector<1x8x8x128xbf16>,
    %c0_55 = arith.constant 0 : index
    %c0_56 = arith.constant 0 : index
    %c0_57 = arith.constant 0 : index
    %c0_58 = arith.constant 0 : index
    %39 = vector.load %arg1[%c0_55, %c0_56, %c0_57, %c0_58] : memref<1x9x9x32xbf16, #tpu.memory_space<vmem>>, vector<1x8x8x32xbf16>
    %40 = vector.shape_cast %39 : vector<1x8x8x32xbf16> to vector<64x32xbf16>
    %c0_59 = arith.constant 0 : index
    %c0_60 = arith.constant 0 : index
    %41 = vector.load %arg5[%c0_59, %c0_60] : memref<32x128xbf16, #tpu.memory_space<vmem>>, vector<32x128xbf16>
    %cst_61 = arith.constant dense<0.000000e+00> : vector<64x128xf32>
    %42 = tpu.matmul %40, %41, %cst_61 {dimension_numbers = #tpu.dot_dimension_numbers<[1], [0], [0], [1], [0, 0, 1, 1], [], []>} : vector<64x32xbf16>, vector<32x128xbf16>, vector<64x128xf32> -> vector<64x128xf32>
    %c0_62 = arith.constant 0 : index
    %c0_63 = arith.constant 0 : index
    %c7 = arith.constant 7 : index
    %c0_64 = arith.constant 0 : index
    %43 = vector.load %arg8[%c0_62, %c0_63, %c7, %c0_64] : memref<1x9x24x256xbf16, #tpu.memory_space<vmem>>, vector<1x8x8x256xbf16>
    %44 = vector.shape_cast %43 : vector<1x8x8x256xbf16> to vector<64x256xbf16>
    %c0_65 = arith.constant 0 : index
    %c0_66 = arith.constant 0 : index
    %c0_67 = arith.constant 0 : index
    %45 = vector.load %arg3[%c0_65, %c0_66, %c0_67] : memref<3x256x128xbf16, #tpu.memory_space<vmem>>, vector<1x256x128xbf16>
    %46 = vector.shape_cast %45 : vector<1x256x128xbf16> to vector<256x128xbf16>
    %cst_68 = arith.constant dense<0.000000e+00> : vector<64x128xf32>
    %47 = tpu.matmul %44, %46, %cst_68 {dimension_numbers = #tpu.dot_dimension_numbers<[1], [0], [0], [1], [0, 0, 1, 1], [], []>} : vector<64x256xbf16>, vector<256x128xbf16>, vector<64x128xf32> -> vector<64x128xf32>
    %48 = arith.addf %42, %47 : vector<64x128xf32>
    %c0_69 = arith.constant 0 : index
    %c1_70 = arith.constant 1 : index
    %c7_71 = arith.constant 7 : index
    %c128_72 = arith.constant 128 : index
    %49 = vector.load %arg8[%c0_69, %c1_70, %c7_71, %c128_72] : memref<1x9x24x256xbf16, #tpu.memory_space<vmem>>, vector<1x8x8x128xbf16>
    %50 = vector.shape_cast %49 : vector<1x8x8x128xbf16> to vector<64x128xbf16>
    %c0_73 = arith.constant 0 : index
    %c0_74 = arith.constant 0 : index
    %c0_75 = arith.constant 0 : index
    %51 = vector.load %arg4[%c0_73, %c0_74, %c0_75] : memref<3x128x128xbf16, #tpu.memory_space<vmem>>, vector<1x128x128xbf16>
    %52 = vector.shape_cast %51 : vector<1x128x128xbf16> to vector<128x128xbf16>
    %cst_76 = arith.constant dense<0.000000e+00> : vector<64x128xf32>
    %53 = tpu.matmul %50, %52, %cst_76 {dimension_numbers = #tpu.dot_dimension_numbers<[1], [0], [0], [1], [0, 0, 1, 1], [], []>} : vector<64x128xbf16>, vector<128x128xbf16>, vector<64x128xf32> -> vector<64x128xf32>
    %54 = arith.addf %48, %53 : vector<64x128xf32>
    %c0_77 = arith.constant 0 : index
    %c0_78 = arith.constant 0 : index
    %c8_79 = arith.constant 8 : index
    %c0_80 = arith.constant 0 : index
    %55 = vector.load %arg8[%c0_77, %c0_78, %c8_79, %c0_80] : memref<1x9x24x256xbf16, #tpu.memory_space<vmem>>, vector<1x8x8x256xbf16>
    %56 = vector.shape_cast %55 : vector<1x8x8x256xbf16> to vector<64x256xbf16>
    %c1_81 = arith.constant 1 : index
    %c0_82 = arith.constant 0 : index
    %c0_83 = arith.constant 0 : index
    %57 = vector.load %arg3[%c1_81, %c0_82, %c0_83] : memref<3x256x128xbf16, #tpu.memory_space<vmem>>, vector<1x256x128xbf16>
    %58 = vector.shape_cast %57 : vector<1x256x128xbf16> to vector<256x128xbf16>
    %cst_84 = arith.constant dense<0.000000e+00> : vector<64x128xf32>
    %59 = tpu.matmul %56, %58, %cst_84 {dimension_numbers = #tpu.dot_dimension_numbers<[1], [0], [0], [1], [0, 0, 1, 1], [], []>} : vector<64x256xbf16>, vector<256x128xbf16>, vector<64x128xf32> -> vector<64x128xf32>
    %60 = arith.addf %54, %59 : vector<64x128xf32>
    %c0_85 = arith.constant 0 : index
    %c1_86 = arith.constant 1 : index
    %c8_87 = arith.constant 8 : index
    %c128_88 = arith.constant 128 : index
    %61 = vector.load %arg8[%c0_85, %c1_86, %c8_87, %c128_88] : memref<1x9x24x256xbf16, #tpu.memory_space<vmem>>, vector<1x8x8x128xbf16>
    %62 = vector.shape_cast %61 : vector<1x8x8x128xbf16> to vector<64x128xbf16>
    %c1_89 = arith.constant 1 : index
    %c0_90 = arith.constant 0 : index
    %c0_91 = arith.constant 0 : index
    %63 = vector.load %arg4[%c1_89, %c0_90, %c0_91] : memref<3x128x128xbf16, #tpu.memory_space<vmem>>, vector<1x128x128xbf16>
    %64 = vector.shape_cast %63 : vector<1x128x128xbf16> to vector<128x128xbf16>
    %cst_92 = arith.constant dense<0.000000e+00> : vector<64x128xf32>
    %65 = tpu.matmul %62, %64, %cst_92 {dimension_numbers = #tpu.dot_dimension_numbers<[1], [0], [0], [1], [0, 0, 1, 1], [], []>} : vector<64x128xbf16>, vector<128x128xbf16>, vector<64x128xf32> -> vector<64x128xf32>
    %66 = arith.addf %60, %65 : vector<64x128xf32>
    %c0_93 = arith.constant 0 : index
    %c0_94 = arith.constant 0 : index
    %c9 = arith.constant 9 : index
    %c0_95 = arith.constant 0 : index
    %67 = vector.load %arg8[%c0_93, %c0_94, %c9, %c0_95] : memref<1x9x24x256xbf16, #tpu.memory_space<vmem>>, vector<1x8x8x256xbf16>
    %68 = vector.shape_cast %67 : vector<1x8x8x256xbf16> to vector<64x256xbf16>
    %c2_96 = arith.constant 2 : index
    %c0_97 = arith.constant 0 : index
    %c0_98 = arith.constant 0 : index
    %69 = vector.load %arg3[%c2_96, %c0_97, %c0_98] : memref<3x256x128xbf16, #tpu.memory_space<vmem>>, vector<1x256x128xbf16>
    %70 = vector.shape_cast %69 : vector<1x256x128xbf16> to vector<256x128xbf16>
    %cst_99 = arith.constant dense<0.000000e+00> : vector<64x128xf32>
    %71 = tpu.matmul %68, %70, %cst_99 {dimension_numbers = #tpu.dot_dimension_numbers<[1], [0], [0], [1], [0, 0, 1, 1], [], []>} : vector<64x256xbf16>, vector<256x128xbf16>, vector<64x128xf32> -> vector<64x128xf32>
    %72 = arith.addf %66, %71 : vector<64x128xf32>
    %c0_100 = arith.constant 0 : index
    %c1_101 = arith.constant 1 : index
    %c9_102 = arith.constant 9 : index
    %c128_103 = arith.constant 128 : index
    %73 = vector.load %arg8[%c0_100, %c1_101, %c9_102, %c128_103] : memref<1x9x24x256xbf16, #tpu.memory_space<vmem>>, vector<1x8x8x128xbf16>
    %74 = vector.shape_cast %73 : vector<1x8x8x128xbf16> to vector<64x128xbf16>
    %c2_104 = arith.constant 2 : index
    %c0_105 = arith.constant 0 : index
    %c0_106 = arith.constant 0 : index
    %75 = vector.load %arg4[%c2_104, %c0_105, %c0_106] : memref<3x128x128xbf16, #tpu.memory_space<vmem>>, vector<1x128x128xbf16>
    %76 = vector.shape_cast %75 : vector<1x128x128xbf16> to vector<128x128xbf16>
    %cst_107 = arith.constant dense<0.000000e+00> : vector<64x128xf32>
    %77 = tpu.matmul %74, %76, %cst_107 {dimension_numbers = #tpu.dot_dimension_numbers<[1], [0], [0], [1], [0, 0, 1, 1], [], []>} : vector<64x128xbf16>, vector<128x128xbf16>, vector<64x128xf32> -> vector<64x128xf32>
    %78 = arith.addf %72, %77 : vector<64x128xf32>
    %79 = vector.broadcast %1 : vector<1x128xf32> to vector<64x128xf32>
    %80 = arith.addf %78, %79 : vector<64x128xf32>
    %cst_108 = arith.constant 0.000000e+00 : f32
    %81 = vector.broadcast %cst_108 : f32 to vector<64x128xf32>
    %82 = arith.maximumf %80, %81 : vector<64x128xf32>
    %83 = vector.shape_cast %82 : vector<64x128xf32> to vector<1x8x8x128xf32>
    %84 = arith.truncf %83 : vector<1x8x8x128xf32> to vector<1x8x8x128xbf16>
    %c0_109 = arith.constant 0 : index
    %c0_110 = arith.constant 0 : index
    %c0_111 = arith.constant 0 : index
    %c0_112 = arith.constant 0 : index
    %85 = vector.load %arg7[%c0_109, %c0_110, %c0_111, %c0_112] : memref<1x8x8x128xbf16, #tpu.memory_space<vmem>>, vector<1x8x8x128xbf16>
    tpu.vector_store %arg7[%c0_109, %c0_110, %c0_111, %c0_112], %84 {strides = array<i32>} : memref<1x8x8x128xbf16, #tpu.memory_space<vmem>>, vector<1x8x8x128xbf16>,
    return
  }
  func.func @transform_0(%arg0: i32) -> (i32, i32, i32, i32) {
    %c0_i32 = arith.constant 0 : i32
    %c0_i32_0 = arith.constant 0 : i32
    %c0_i32_1 = arith.constant 0 : i32
    %c0_i32_2 = arith.constant 0 : i32
    return %arg0, %c0_i32, %c0_i32_0, %c0_i32_1 : i32, i32, i32, i32
  }
  func.func @transform_1(%arg0: i32) -> (i32, i32, i32) {
    %c0_i32 = arith.constant 0 : i32
    %c0_i32_0 = arith.constant 0 : i32
    %c0_i32_1 = arith.constant 0 : i32
    %c0_i32_2 = arith.constant 0 : i32
    return %c0_i32, %c0_i32_0, %c0_i32_1 : i32, i32, i32
  }
  func.func @transform_2(%arg0: i32) -> (i32, i32, i32) {
    %c0_i32 = arith.constant 0 : i32
    %c0_i32_0 = arith.constant 0 : i32
    %c0_i32_1 = arith.constant 0 : i32
    %c0_i32_2 = arith.constant 0 : i32
    return %c0_i32, %c0_i32_0, %c0_i32_1 : i32, i32, i32
  }
  func.func @transform_3(%arg0: i32) -> (i32, i32, i32) {
    %c0_i32 = arith.constant 0 : i32
    %c0_i32_0 = arith.constant 0 : i32
    %c0_i32_1 = arith.constant 0 : i32
    %c0_i32_2 = arith.constant 0 : i32
    return %c0_i32, %c0_i32_0, %c0_i32_1 : i32, i32, i32
  }
  func.func @transform_4(%arg0: i32) -> (i32, i32) {
    %c0_i32 = arith.constant 0 : i32
    %c0_i32_0 = arith.constant 0 : i32
    %c0_i32_1 = arith.constant 0 : i32
    return %c0_i32, %c0_i32_0 : i32, i32
  }
  func.func @transform_5(%arg0: i32) -> (i32, i32) {
    %c0_i32 = arith.constant 0 : i32
    %c0_i32_0 = arith.constant 0 : i32
    %c0_i32_1 = arith.constant 0 : i32
    return %c0_i32, %c0_i32_0 : i32, i32
  }
  func.func @transform_6(%arg0: i32) -> (i32, i32, i32, i32) {
    %c0_i32 = arith.constant 0 : i32
    %c0_i32_0 = arith.constant 0 : i32
    %c0_i32_1 = arith.constant 0 : i32
    %c0_i32_2 = arith.constant 0 : i32
    return %arg0, %c0_i32, %c0_i32_0, %c0_i32_1 : i32, i32, i32, i32
  }
}

</mosaic_0001>

<bundles_post_ra>
// kernel: _lambda_.1
= control target key start
LH: loop header
LB: loop body
LE: loop exit
PB: predicated region body
PF: predicated region fallthrough
CT: control target
= control target key end

     0   :  { %s3862_s21 = smov 0   ;;  %s4639_s0 = inlined_call_operand.vmem [shape: bf16[2,9,9,32], index: 0, kind: input, shape index: {}]   ;;  %s4640_s1 = inlined_call_operand.vmem [shape: bf16[4,32,128], index: 1, kind: input, shape index: {}]   ;;  %s4641_s2 = inlined_call_operand.vmem [shape: bf16[3,256,128], index: 2, kind: input, shape index: {}]   ;;  %s4642_s3 = inlined_call_operand.vmem [shape: bf16[3,128,128], index: 3, kind: input, shape index: {}]   ;;  %s4643_s4 = inlined_call_operand.vmem [shape: bf16[32,128], index: 4, kind: input, shape index: {}]   ;;  %s4644_s5 = inlined_call_operand.vmem [shape: f32[2,128], index: 5, kind: input, shape index: {}]   ;;  %s4645_s6 = inlined_call_operand.vmem [shape: bf16[2,8,8,128], index: 6, kind: output, shape index: {}]  }
   0x1 LB: > { %s2954_s22 = sadd.s32 4294967295, %s3824_s21   ;;  %p2958_p0 = scmp.ge.s32.totalorder %s3824_s21, 1  ;;  %s3824_s21 = sphi %s3862_s21, %s16_s21  }
   0x2   : > { %p212_p1 = scmp.lt.s32.totalorder %s3824_s21, 3 }
   0x4   : > { %p213_p2 = pnand %p2958_p0, %p212_p1 }
   0x5   : > { %v3712_v0 = vld [vmem:[%s4640_s1] sm:$0xff] (!%p213_p2)   ;;  %p242_p3 = scmp.lt.s32.totalorder (!%p213_p2), %s2954_s22, 1  ;;  %v3713_v1 = vld [vmem:[%s4640_s1 + $0x8] sm:$0xff] (!%p213_p2)   ;;  %v3723_v3 = vld [vmem:[%s4640_s1 + $0x10] sm:$0xff] (!%p213_p2)   ;;  %vm419_vm0 = vcmask (!%p213_p2), 261120  }
   0x6   : > { %216 = sbr.rel (%p213_p2) target bundleno = 624 (0x270), region = 44  ;;  %3510 = vmatprep.subr.bf16.mxu0 (!%p213_p2), %v3712_v0  ;;  %v3716_v2 = vld [vmem:[%s4640_s1 + $0x20] sm:$0xff] (!%p213_p2)   ;;  %3498 = vmatprep.subr.bf16.mxu1 (!%p213_p2), %v3723_v3  ;;  %v3727_v16 = vld [vmem:[%s4640_s1 + $0x18] sm:$0xff] (!%p213_p2)   ;;  %v3719_v29 = vld [vmem:[%s4640_s1 + $0x28] sm:$0xff] (!%p213_p2)   ;;  %vm275_vm1 = vsmask.f32 (!%p213_p2), 3328 }
   0x7   : > { %3511 = vmatpush3.bf16.msra.mxu0 (!%p213_p2), %v3712_v0  ;;  %3499 = vmatpush3.bf16.msra.mxu1 (!%p213_p2), %v3723_v3  ;;  %v3910_v41 = vld [vmem:[%s4640_s1 + $0x30] sm:$0xff] (!%p213_p2)   ;;  %vm276_vm2 = vsmask.f32 (!%p213_p2), 7440  ;;  %vm1101_vm4 = vsmask.f32 (!%p213_p2), 256 }
   0x8   : > { %3512 = vmatprep.subr.bf16.mxu0 (!%p213_p2), %v3713_v1  ;;  %3500 = vmatprep.subr.bf16.mxu1 (!%p213_p2), %v3727_v16  ;;  %vm3933_vm3 = vmor (!%p213_p2), %vm275_vm1, %vm276_vm2  ;;  %vm1102_vm5 = vsmask.f32 (!%p213_p2), 4368 }
   0x9   : > { %vm4225_vm6 = vmor (!%p213_p2), %vm1101_vm4, %vm1102_vm5 }
   0xb   : > { %3513 = vmatpush3.bf16.msra.mxu0 (!%p213_p2), %v3713_v1  ;;  %3501 = vmatpush3.bf16.msra.mxu1 (!%p213_p2), %v3727_v16 }
   0xc   : > { %3522 = vmatprep.subr.bf16.mxu0 (!%p213_p2), %v3716_v2 }
   0xd   : > { %s4652_s22 = smov (!%p242_p3, %s2954_s22), 1 }
   0xe   : > { %s3702_s27 = smul.u32 72, %s4652_s22  ;;  %s3280_s19 = sshll.u32 %s4652_s22, 5 }
   0xf   : > { %s251_s24 = scalar_lea.vmem %s4645_s6, %s3280_s19 }
  0x10   : > { %s3888_s10 = scalar_lea.vmem %s4639_s0, %s3702_s27 }
  0x11   : > { %v255_v4 = vld [vmem:[%s3888_s10] sm:$0xf]  ;;  %v256_v5 = vld [vmem:[%s3888_s10 + $0x8] sm:$0xf]  ;;  %v257_v6 = vld [vmem:[%s3888_s10 + $0x10] sm:$0xf] }
  0x12   : > { %v279_v7 = vshrl.u32 %v255_v4, 16  ;;  %v282_v8 = vshll.u32 %v255_v4, 16  ;;  %v293_v9 = vshrl.u32 %v256_v5, 16  ;;  %v296_v10 = vshll.u32 %v256_v5, 16  ;;  %v258_v11 = vld [vmem:[%s3888_s10 + $0x18] sm:$0xf] }
  0x13   : > { %v2976_v12 = vcombine.low %v255_v4, %v256_v5  ;;  %v307_v13 = vshrl.u32 %v257_v6, 16  ;;  %v310_v14 = vshll.u32 %v257_v6, 16  ;;  %v321_v15 = vshrl.u32 %v258_v11, 16  ;;  %v259_v19 = vld [vmem:[%s3888_s10 + $0x20] sm:$0xf] }
  0x14   : > { %v281_v17 = vrot.slane %v279_v7, 4  ;;  %v284_v18 = vrot.slane %v282_v8, 5  ;;  %v260_v20 = vld [vmem:[%s3888_s10 + $0x28] sm:$0xf]  ;;  %v295_v21 = vrot.slane %v293_v9, 4  ;;  %v298_v22 = vrot.slane %v296_v10, 5 }
  0x15   : > { %3514 = vmatprep.mubr.msk.bf16.mxu0 %vm419_vm0, %v2976_v12  ;;  %v309_v23 = vrot.slane %v307_v13, 4  ;;  %v324_v24 = vshll.u32 %v258_v11, 16  ;;  %v312_v25 = vrot.slane %v310_v14, 5  ;;  %v2977_v26 = vcombine.low %v257_v6, %v258_v11  ;;  %v261_v33 = vld [vmem:[%s3888_s10 + $0x30] sm:$0xf] }
  0x16   : > { %v335_v27 = vshrl.u32 %v259_v19, 16  ;;  %v338_v28 = vshll.u32 %v259_v19, 16  ;;  %v349_v30 = vshrl.u32 %v260_v20, 16  ;;  %v352_v31 = vshll.u32 %v260_v20, 16  ;;  %v262_v34 = vld [vmem:[%s3888_s10 + $0x38] sm:$0xf] }
  0x17   : > { %v2978_v32 = vcombine.low %v259_v19, %v260_v20  ;;  %3515 = vmatmul.mubr.msk.bf16.vlgmr.msra.gmra.mrb[0].mxu0 %vm419_vm0, %v2977_v26  ;;  %v363_v35 = vshrl.u32 %v261_v33, 16  ;;  %v366_v36 = vshll.u32 %v261_v33, 16  ;;  %v323_v37 = vrot.slane %v321_v15, 4  ;;  %v3720_v46 = vld [vmem:[%s3888_s10 + $0x8] ss:$8 sps:$4 sm:$0xff]  }
  0x18   : > { %v326_v38 = vrot.slane %v324_v24, 5  ;;  %3523 = vmatpush3.bf16.msra.mxu0 %v3716_v2  ;;  %v377_v39 = vshrl.u32 %v262_v34, 16  ;;  %v380_v40 = vshll.u32 %v262_v34, 16  ;;  %v3912_v42 = vrot.slane %v335_v27, 4  ;;  %v267_v56 = vld [vmem:[%s3888_s10 + $0x4] sm:$0x1] }
  0x19   : > { %3518 = vmatprep.mubr.msk.bf16.mxu0 %vm419_vm0, %v2978_v32  ;;  %v3914_v43 = vrot.slane %v338_v28, 5  ;;  %3524 = vmatprep.subr.bf16.mxu0 %v3719_v29  ;;  %v3916_v44 = vrot.slane %v349_v30, 4  ;;  %v3918_v45 = vrot.slane %v352_v31, 5  ;;  %v285_v47 = vor.u32 %v284_v18, %v281_v17  ;;  %v268_v57 = vld [vmem:[%s3888_s10 + $0xc] sm:$0x1]  ;;  %v3726_v32 = vld [vmem:[%s4640_s1 + $0x38] sm:$0xff]  }
  0x1a   : > { %v3921_v48 = vrot.slane %v363_v35, 4  ;;  %v3923_v49 = vrot.slane %v366_v36, 5  ;;  %v2979_v50 = vcombine.low %v261_v33, %v262_v34  ;;  %v299_v51 = vor.u32 %v298_v22, %v295_v21  ;;  %v269_v63 = vld [vmem:[%s3888_s10 + $0x14] sm:$0x1]  ;;  %v270_v0 = vld [vmem:[%s3888_s10 + $0x1c] sm:$0x1] }
  0x1b   : > { %v3925_v52 = vrot.slane %v377_v39, 4  ;;  %v3927_v53 = vrot.slane %v380_v40, 5  ;;  %v313_v54 = vor.u32 %v312_v25, %v309_v23  ;;  %v327_v55 = vor.u32 %v326_v38, %v323_v37  ;;  %v3008_v7 = vld [vmem:[%s3888_s10 + $0x8] sm:$0xf]  ;;  %v3721_v8 = vld [vmem:[%s3888_s10 + $0x18] ss:$8 sps:$4 sm:$0xff]  }
  0x1c   : > { %3525 = vmatpush3.bf16.msra.mxu0 %v3719_v29  ;;  %v286_v58 = vrot.slane %v285_v47, 4  ;;  %v288_v59 = vshll.u32 %v267_v56, 16  ;;  %v300_v61 = vrot.slane %v299_v51, 4  ;;  %v302_v62 = vshll.u32 %v268_v57, 16  ;;  %v3009_v11 = vld [vmem:[%s3888_s10 + $0xc] sm:$0x1] }
  0x1d   : > { %3534 = vmatprep.subr.bf16.mxu0 %v3910_v41  ;;  %v341_v1 = vor.u32 %v3914_v43, %v3912_v42  ;;  %v355_v2 = vor.u32 %v3918_v45, %v3916_v44  ;;  %v314_v4 = vrot.slane %v313_v54, 4  ;;  %v316_v5 = vshll.u32 %v269_v63, 16  ;;  %v3010_v12 = vld [vmem:[%s3888_s10 + $0x10] sm:$0xf]  ;;  %v3011_v18 = vld [vmem:[%s3888_s10 + $0x14] sm:$0x1] }
  0x1e   : > { %v290_v3 = vrot.slane %v288_v59, 5  ;;  %v328_v6 = vrot.slane %v327_v55, 4  ;;  %v304_v9 = vrot.slane %v302_v62, 5  ;;  %v330_v10 = vshll.u32 %v270_v0, 16  ;;  %v3724_v15 = vld [vmem:[%s3888_s10 + $0x28] ss:$8 sps:$4 sm:$0xff]  }
  0x1f   : > { %3519 = vmatmul.mubr.msk.bf16.gmra.mrb[4].mxu0 %vm419_vm0, %v2979_v50  ;;  %v369_v13 = vor.u32 %v3923_v49, %v3921_v48  ;;  %v383_v14 = vor.u32 %v3927_v53, %v3925_v52  ;;  %v318_v17 = vrot.slane %v316_v5, 5  ;;  %v754_v19 = vshrl.u32 %v3008_v7, 16  ;;  %v3012_v25 = vld [vmem:[%s3888_s10 + $0x18] sm:$0xf]  ;;  %v3013_v30 = vld [vmem:[%s3888_s10 + $0x1c] sm:$0x1] }
  0x20   : > { %3526 = vmatprep.mubr.msk.bf16.mxu0 %vm419_vm0, %v3720_v46  ;;  %v291_v16 = vsel %vm3933_vm3, %v286_v58, %v290_v3  ;;  %v757_v20 = vshll.u32 %v3008_v7, 16  ;;  %v305_v21 = vsel %vm3933_vm3, %v300_v61, %v304_v9  ;;  %v332_v22 = vrot.slane %v330_v10, 5  ;;  %v3014_v31 = vld [vmem:[%s3888_s10 + $0x20] sm:$0xf]  ;;  %v3015_v40 = vld [vmem:[%s3888_s10 + $0x24] sm:$0x1] }
  0x21   : > { %v763_v23 = vshll.u32 %v3009_v11, 16  ;;  %v768_v24 = vshrl.u32 %v3010_v12, 16  ;;  %v2966_v26 = vcombine.low %v291_v16, %v305_v21  ;;  %v319_v27 = vsel %vm3933_vm3, %v314_v4, %v318_v17  ;;  %v271_v55 = vld [vmem:[%s3888_s10 + $0x24] sm:$0x1]  ;;  %v272_v62 = vld [vmem:[%s3888_s10 + $0x2c] sm:$0x1] }
  0x22   : > { %v756_v28 = vrot.slane %v754_v19, 4  ;;  %v759_v29 = vrot.slane %v757_v20, 5  ;;  %v333_v33 = vsel %vm3933_vm3, %v328_v6, %v332_v22  ;;  %v771_v36 = vshll.u32 %v3010_v12, 16  ;;  %v3975_v56 = vld [vmem:[%s4643_s4] sm:$0xff]   ;;  %v3016_v5 = vld [vmem:[%s3888_s10 + $0x28] sm:$0xf] }
  0x23   : > { %v765_v34 = vrot.slane %v763_v23, 5  ;;  %v770_v35 = vrot.slane %v768_v24, 4  ;;  %3502 = vmatprep.mubr.msk.bf16.mxu1 %vm419_vm0, %v2966_v26  ;;  %v2967_v37 = vcombine.low %v319_v27, %v333_v33  ;;  %v777_v39 = vshll.u32 %v3011_v18, 16  ;;  %v3725_v6 = vld [vmem:[%s3888_s10 + $0x38] ss:$8 sps:$4 sm:$0xff]  }
  0x24   : > { %v760_v38 = vor.u32 %v759_v29, %v756_v28  ;;  %v782_v46 = vshrl.u32 %v3012_v25, 16  ;;  %v773_v47 = vrot.slane %v771_v36, 5  ;;  %v785_v50 = vshll.u32 %v3012_v25, 16  ;;  %v3017_v17 = vld [vmem:[%s3888_s10 + $0x2c] sm:$0x1] }
  0x25   : > { %v791_v51 = vshll.u32 %v3013_v30, 16  ;;  %v796_v54 = vshrl.u32 %v3014_v31, 16  ;;  %v779_v58 = vrot.slane %v777_v39, 5  ;;  %v799_v61 = vshll.u32 %v3014_v31, 16  ;;  %3503 = vmatmul.mubr.msk.bf16.vlgmr.msra.gmra.mrb[0].mxu1 %vm419_vm0, %v2967_v37  ;;  %v3018_v21 = vld [vmem:[%s3888_s10 + $0x30] sm:$0xf] }
  0x26   : > { %v761_v57 = vrot.slane %v760_v38, 4  ;;  %v784_v59 = vrot.slane %v782_v46, 4  ;;  %v774_v63 = vor.u32 %v773_v47, %v770_v35  ;;  %v787_v0 = vrot.slane %v785_v50, 5  ;;  %v3019_v23 = vld [vmem:[%s3888_s10 + $0x34] sm:$0x1] }
  0x27   : > { %3527 = vmatmul.mubr.msk.bf16.vlgmr.msra.gmra.mrb[0].mxu0 %vm419_vm0, %v3721_v8  ;;  %v793_v3 = vrot.slane %v791_v51, 5  ;;  %v798_v4 = vrot.slane %v796_v54, 4  ;;  %v801_v8 = vrot.slane %v799_v61, 5  ;;  %v805_v9 = vshll.u32 %v3015_v40, 16  ;;  %v273_v26 = vld [vmem:[%s3888_s10 + $0x34] sm:$0x1] }
  0x28   : > { %3535 = vmatpush3.bf16.msra.mxu0 %v3910_v41  ;;  %3530 = vmatprep.mubr.msk.bf16.mxu0 %vm419_vm0, %v3724_v15  ;;  %v3736_v41 = vld [vmem:[%s4641_s2 + $0x40] sm:$0xff]   ;;  %v766_v7 = vsel %vm3933_vm3, %v761_v57, %v765_v34  ;;  %v342_v10 = vrot.slane %v341_v1, 4  ;;  %v775_v11 = vrot.slane %v774_v63, 4  ;;  %v788_v12 = vor.u32 %v787_v0, %v784_v59  ;;  %v274_v31 = vld [vmem:[%s3888_s10 + $0x3c] sm:$0x1] }
  0x29   : > { %3536 = vmatprep.subr.bf16.mxu0 %v3726_v32  ;;  %v344_v15 = vshll.u32 %v271_v55, 16  ;;  %v356_v16 = vrot.slane %v355_v2, 4  ;;  %3336 = vmatprep.subr.bf16.mxu1 %v3736_v41  ;;  %v802_v18 = vor.u32 %v801_v8, %v798_v4  ;;  %v807_v19 = vrot.slane %v805_v9, 5  ;;  %v3021_v37 = vld [vmem:[%s3888_s10 + $0x3c] sm:$0x1] }
  0x2a   : > { %v358_v20 = vshll.u32 %v272_v62, 16  ;;  %v810_v22 = vshrl.u32 %v3016_v5, 16  ;;  %v780_v42 = vsel %vm3933_vm3, %v775_v11, %v779_v58  ;;  %v789_v43 = vrot.slane %v788_v12, 4  ;;  %v3022_v47 = vld [vmem:[%s3888_s10 + $0x40] sm:$0xf] }
  0x2b   : > { %v346_v1 = vrot.slane %v344_v15, 5  ;;  %v813_v24 = vshll.u32 %v3016_v5, 16  ;;  %v3028_v44 = vcombine.low %v766_v7, %v780_v42  ;;  %v803_v45 = vrot.slane %v802_v18, 4  ;;  %v3023_v0 = vld [vmem:[%s3888_s10 + $0x44] sm:$0x1] }
  0x2c   : > { %3537 = vmatpush3.bf16.msra.mxu0 %v3726_v32  ;;  %v360_v2 = vrot.slane %v358_v20, 5  ;;  %v812_v25 = vrot.slane %v810_v22, 4  ;;  %v794_v27 = vsel %vm3933_vm3, %v789_v43, %v793_v3  ;;  %v819_v30 = vshll.u32 %v3017_v17, 16  ;;  %v3020_v32 = vld [vmem:[%s3888_s10 + $0x38] sm:$0xf]  ;;  %v3731_v17 = vld [vmem:[%s4641_s2 + $0xc0] sm:$0xff]  }
  0x2d   : > { %3546 = vmatprep.subr.bf16.mxu0 %v3975_v56  ;;  %v347_v28 = vsel %vm3933_vm3, %v342_v10, %v346_v1  ;;  %v815_v29 = vrot.slane %v813_v24, 5  ;;  %v808_v33 = vsel %vm3933_vm3, %v803_v45, %v807_v19  ;;  %v824_v35 = vshrl.u32 %v3018_v21, 16  ;;  %v3730_v1 = vld [vmem:[%s3888_s10] ss:$8 sps:$4 sm:$0xff]  }
  0x2e   : > { %v361_v34 = vsel %vm3933_vm3, %v356_v16, %v360_v2  ;;  %v827_v36 = vshll.u32 %v3018_v21, 16  ;;  %v3029_v38 = vcombine.low %v794_v27, %v808_v33  ;;  %v821_v46 = vrot.slane %v819_v30, 5  ;;  %v3733_v45 = vld [vmem:[%s4641_s2 + $0x80] sm:$0xff]   ;;  %v3734_v2 = vld [vmem:[%s4641_s2 + $0xc8] sm:$0xff]   ;;  %v3738_v27 = vld [vmem:[%s4641_s2 + $0xd0] sm:$0xff]  }
  0x2f   : > { %3531 = vmatmul.mubr.msk.bf16.gmra.mrb[4].mxu0 %vm419_vm0, %v3725_v6  ;;  %v2968_v39 = vcombine.low %v347_v28, %v361_v34  ;;  %v816_v40 = vor.u32 %v815_v29, %v812_v25  ;;  %v826_v50 = vrot.slane %v824_v35, 4  ;;  %v833_v54 = vshll.u32 %v3019_v23, 16  ;;  %v3735_v25 = vld [vmem:[%s4641_s2 + $0x88] sm:$0xff]   ;;  %v3739_v28 = vld [vmem:[%s4641_s2 + $0x90] sm:$0xff]   ;;  %v3746_v35 = vld [vmem:[%s4641_s2 + $0xe0] sm:$0xff]  }
  0x30   : > { %3538 = vmatprep.mubr.msk.bf16.mxu0 %vm419_vm0, %v3028_v44  ;;  %v829_v51 = vrot.slane %v827_v36, 5  ;;  %v370_v55 = vrot.slane %v369_v13, 4  ;;  %v372_v58 = vshll.u32 %v273_v26, 16  ;;  %v384_v59 = vrot.slane %v383_v14, 4  ;;  %v3729_v13 = vld [vmem:[%s4643_s4 + $0x8] sm:$0xff]   ;;  %v3737_v26 = vld [vmem:[%s4641_s2] sm:$0xff]  }
  0x31   : > { %3506 = vmatprep.mubr.msk.bf16.mxu1 %vm419_vm0, %v2968_v39  ;;  %v817_v57 = vrot.slane %v816_v40, 4  ;;  %v386_v61 = vshll.u32 %v274_v31, 16  ;;  %v835_v63 = vrot.slane %v833_v54, 5  ;;  %v838_v3 = vshrl.u32 %v3020_v32, 16  ;;  %v3732_v44 = vld [vmem:[%s3888_s10 + $0x10] ss:$8 sps:$4 sm:$0xff]   ;;  %3337 = vmatpush3.bf16.msra.mxu1 %v3737_v26 }
  0x32   : > { %v830_v62 = vor.u32 %v829_v51, %v826_v50  ;;  %v841_v4 = vshll.u32 %v3020_v32, 16  ;;  %v374_v41 = vrot.slane %v372_v58, 5  ;;  %v847_v49 = vshll.u32 %v3021_v37, 16  ;;  %v3740_v29 = vld [vmem:[%s4641_s2 + $0x48] sm:$0xff]   ;;  %v3742_v31 = vld [vmem:[%s4641_s2 + $0xd8] sm:$0xff]   ;;  %v3744_v33 = vld [vmem:[%s4641_s2 + $0x50] sm:$0xff]  }
  0x33   : > { %v822_v5 = vsel %vm3933_vm3, %v817_v57, %v821_v46  ;;  %v388_v48 = vrot.slane %v386_v61, 5  ;;  %v840_v7 = vrot.slane %v838_v3, 4  ;;  %v852_v53 = vshrl.u32 %v3022_v47, 16  ;;  %v3741_v30 = vld [vmem:[%s4641_s2 + $0x8] sm:$0xff]   ;;  %3338 = vmatprep.subr.bf16.mxu1 %v3740_v29  ;;  %v3743_v32 = vld [vmem:[%s4641_s2 + $0x98] sm:$0xff]   ;;  %v3745_v34 = vld [vmem:[%s4641_s2 + $0x10] sm:$0xff]  }
  0x34   : > { %v831_v6 = vrot.slane %v830_v62, 4  ;;  %v843_v52 = vrot.slane %v841_v4, 5  ;;  %v375_v14 = vsel %vm3933_vm3, %v370_v55, %v374_v41  ;;  %v849_v9 = vrot.slane %v847_v49, 5  ;;  %v3747_v36 = vld [vmem:[%s4641_s2 + $0xa0] sm:$0xff]   ;;  %v3749_v39 = vld [vmem:[%s4641_s2 + $0x18] sm:$0xff]   ;;  %v3750_v40 = vld [vmem:[%s4641_s2 + $0xe8] sm:$0xff]  }
  0x35   : > { %v389_v8 = vsel %vm3933_vm3, %v384_v59, %v388_v48  ;;  %v855_v10 = vshll.u32 %v3022_v47, 16  ;;  %v854_v16 = vrot.slane %v852_v53, 4  ;;  %v861_v20 = vshll.u32 %v3023_v0, 16  ;;  %3339 = vmatpush3.bf16.msra.mxu1 %v3741_v30  ;;  %v3751_v46 = vld [vmem:[%s4641_s2 + $0xa8] sm:$0xff]   ;;  %v3752_v47 = vld [vmem:[%s4641_s2 + $0x60] sm:$0xff]   ;;  %v3756_v55 = vld [vmem:[%s4641_s2 + $0xf0] sm:$0xff]  }
  0x36   : > { %v836_v11 = vsel %vm3933_vm3, %v831_v6, %v835_v63  ;;  %v2969_v12 = vcombine.low %v375_v14, %v389_v8  ;;  %v844_v15 = vor.u32 %v843_v52, %v840_v7  ;;  %3340 = vmatprep.subr.bf16.mxu1 %v3744_v33  ;;  %v3826_v37 = vmov 0   ;;  %v3753_v50 = vld [vmem:[%s4641_s2 + $0x20] sm:$0xff]   ;;  %v3755_v54 = vld [vmem:[%s3888_s10 + $0x30] ss:$8 sps:$4 sm:$0xff]   ;;  %v3758_v58 = vld [vmem:[%s4641_s2 + $0x68] sm:$0xff]  }
  0x37   : > { %3539 = vmatmul.mubr.msk.bf16.vlgmr.msra.gmra.mrb[0].mxu0 %vm419_vm0, %v3029_v38  ;;  %v3030_v18 = vcombine.low %v822_v5, %v836_v11  ;;  %v857_v19 = vrot.slane %v855_v10, 5  ;;  %v863_v42 = vrot.slane %v861_v20, 5  ;;  %1032 = vst [vmem:[#allocation2 + $0x8] sm:$0xff] %v3826_v37  ;;  %1036 = vst [vmem:[#allocation2 + $0xc8] sm:$0xff] %v3826_v37  ;;  %v3748_v38 = vld [vmem:[%s4641_s2 + $0x58] sm:$0xff]   ;;  %v3757_v57 = vld [vmem:[%s4641_s2 + $0xb0] sm:$0xff]  }
  0x38   : > { %3547 = vmatpush3.bf16.msra.mxu0 %v3975_v56  ;;  %3507 = vmatmul.mubr.msk.bf16.gmra.mrb[4].mxu1 %vm419_vm0, %v2969_v12  ;;  %v845_v21 = vrot.slane %v844_v15, 4  ;;  %1039 = vst [vmem:[#allocation2 + $0x18] sm:$0xff] %v3826_v37  ;;  %1040 = vst [vmem:[#allocation2 + $0x30] sm:$0xff] %v3826_v37  ;;  %v3754_v51 = vld [vmem:[%s3888_s10 + $0x20] ss:$8 sps:$4 sm:$0xff]   ;;  %v3760_v61 = vld [vmem:[%s4641_s2 + $0xf8] sm:$0xff]  }
  0x39   : > { %3548 = vmatprep.subr.bf16.mxu0 %v3729_v13  ;;  %3542 = vmatprep.mubr.msk.bf16.mxu0 %vm419_vm0, %v3030_v18  ;;  %v858_v22 = vor.u32 %v857_v19, %v854_v16  ;;  %1041 = vst [vmem:[#allocation2 + $0x48] sm:$0xff] %v3826_v37  ;;  %1042 = vst [vmem:[#allocation2 + $0x60] sm:$0xff] %v3826_v37  ;;  %v3759_v59 = vld [vmem:[%s4641_s2 + $0x28] sm:$0xff]   ;;  %v3761_v62 = vld [vmem:[%s4641_s2 + $0xb8] sm:$0xff]  }
  0x3a   : > { %v850_v56 = vsel %vm3933_vm3, %v845_v21, %v849_v9  ;;  %3341 = vmatpush3.bf16.msra.mxu1 %v3745_v34  ;;  %1043 = vst [vmem:[#allocation2 + $0x78] sm:$0xff] %v3826_v37  ;;  %1044 = vst [vmem:[#allocation2 + $0x90] sm:$0xff] %v3826_v37  ;;  %v3762_v63 = vld [vmem:[%s4641_s2 + $0x70] sm:$0xff]   ;;  %v3766_v3 = vld [vmem:[%s4641_s2 + $0x140] sm:$0xff]  }
  0x3b   : > { %v859_v43 = vrot.slane %v858_v22, 4  ;;  %1045 = vst [vmem:[#allocation2 + $0xa8] sm:$0xff] %v3826_v37  ;;  %1048 = vst [vmem:[#allocation2 + $0x28] sm:$0xff] %v3826_v37  ;;  %3342 = vmatprep.subr.bf16.mxu1 %v3748_v38  ;;  %v3763_v0 = vld [vmem:[%s4641_s2 + $0x30] sm:$0xff]   ;;  %v3769_v4 = vld [vmem:[%s4641_s2 + $0x78] sm:$0xff]  }
  0x3c   : > { %3549 = vmatpush3.bf16.msra.mxu0 %v3729_v13  ;;  %1049 = vst [vmem:[#allocation2 + $0x40] sm:$0xff] %v3826_v37  ;;  %1050 = vst [vmem:[#allocation2 + $0x58] sm:$0xff] %v3826_v37  ;;  %v3770_v5 = vld [vmem:[%s4641_s2 + $0x38] sm:$0xff]   ;;  %v4150_v41 = vld [vmem:[%s4642_s3] sm:$0xff]  }
  0x3d   : > { %3394 = vmatprep.subr.bf16.mxu0 %v3731_v17  ;;  %v864_v23 = vsel %vm3933_vm3, %v859_v43, %v863_v42  ;;  %1051 = vst [vmem:[#allocation2 + $0x70] sm:$0xff] %v3826_v37  ;;  %1052 = vst [vmem:[#allocation2 + $0x88] sm:$0xff] %v3826_v37  ;;  %v3038_v7 = vld [vmem:[%s4644_s5] ss:$0 sm:$0xff] }
  0x3e   : > { %v3031_v24 = vcombine.low %v850_v56, %v864_v23  ;;  %1053 = vst [vmem:[#allocation2 + $0xa0] sm:$0xff] %v3826_v37  ;;  %1054 = vst [vmem:[#allocation2 + $0xb8] sm:$0xff] %v3826_v37  ;;  %3343 = vmatpush3.bf16.msra.mxu1 %v3749_v39 }
  0x3f   : > { %1038 = vst [vmem:[#allocation2] sm:$0xff] %v3826_v37  ;;  %1046 = vst [vmem:[#allocation2 + $0xc0] sm:$0xff] %v3826_v37  ;;  %3344 = vmatprep.subr.bf16.mxu1 %v3752_v47  ;;  %v1087_v26 = vld [vmem:[#allocation2 + $0x18] sm:$0x88] }
  0x40   : > { %3543 = vmatmul.mubr.msk.bf16.gmra.mrb[4].mxu0 %vm419_vm0, %v3031_v24  ;;  %1047 = vst [vmem:[#allocation2 + $0x10] sm:$0xff] %v3826_v37  ;;  %1055 = vst [vmem:[#allocation2 + $0xd0] sm:$0xff] %v3826_v37  ;;  %v1118_v34 = vshrl.u32 %v1087_v26, 16 }
  0x41   : > { %3550 = vmatprep.mubr.msk.bf16.mxu0 %vm419_vm0, %v3730_v1 }
  0x42   : > { %3345 = vmatpush3.bf16.msra.mxu1 %v3753_v50  ;;  %v4162_v50 = vld [vmem:[#allocation2 + $0x28] sm:$0x11] }
  0x43   : > { %3346 = vmatprep.subr.bf16.mxu1 %v3758_v58  ;;  %v4167_v58 = vld [vmem:[#allocation2 + $0x1c] sm:$0x8] }
  0x46   : > { %3347 = vmatpush3.bf16.msra.mxu1 %v3759_v59 }
  0x47   : > { %3348 = vmatprep.subr.bf16.mxu1 %v3762_v63  ;;  %v4158_v39 = vld [vmem:[#allocation2 + $0x10] sm:$0x11]  ;;  %v4171_v63 = vrot.slane %v1118_v34, 11 }
  0x48   : > { %3551 = vmatmul.mubr.msk.bf16.vlgmr.msra.gmra.mrb[8].mxu0 %vm419_vm0, %v3732_v44  ;;  %v1085_v44 = vld [vmem:[#allocation2] sm:$0x88] }
  0x49   : > { %3395 = vmatpush3.bf16.msra.mxu0 %v3733_v45  ;;  %3554 = vmatprep.mubr.msk.bf16.mxu0 %vm419_vm0, %v3754_v51 }
  0x4a   : > { %3396 = vmatprep.subr.bf16.mxu0 %v3734_v2  ;;  %3349 = vmatpush3.bf16.msra.mxu1 %v3763_v0  ;;  %v1091_v2 = vld [vmem:[#allocation2 + $0x48] sm:$0x88]  ;;  %v2245_v0 = vshll.u32 %v4158_v39, 16 }
  0x4b   : > { %3350 = vmatprep.subr.bf16.mxu1 %v3769_v4 }
  0x4c   : > { %v4239_v39 = vrot.slane %v2245_v0, 5 }
  0x4d   : > { %3397 = vmatpush3.bf16.msra.mxu0 %v3735_v25 }
  0x4e   : > { %3398 = vmatprep.subr.bf16.mxu0 %v3738_v27  ;;  %3351 = vmatpush3.bf16.msra.mxu1 %v3770_v5 }
  0x4f   : > { %3558 = vmatprep.subr.bf16.mxu1 %v4150_v41 }
  0x50   : > { %3555 = vmatmul.mubr.msk.bf16.gmra.mrb[12].mxu0 %vm419_vm0, %v3755_v54 }
  0x51   : > { %3399 = vmatpush3.bf16.msra.mxu0 %v3739_v28  ;;  %v1105_v28 = vshrl.u32 %v1085_v44, 16 }
  0x52   : > { %3400 = vmatprep.subr.bf16.mxu0 %v3742_v31  ;;  %v1144_v31 = vshrl.u32 %v1091_v2, 16 }
  0x53   : > { %v4160_v47 = vrot.slane %v1105_v28, 11 }
  0x55   : > { %3401 = vmatpush3.bf16.msra.mxu0 %v3743_v32 }
  0x56   : > { %3402 = vmatprep.subr.bf16.mxu0 %v3746_v35  ;;  %v4156_v35 = vld [vmem:[#allocation2 + $0x30] sm:$0x88] }
  0x59   : > { %3403 = vmatpush3.bf16.msra.mxu0 %v3747_v36 }
  0x5a   : > { %3404 = vmatprep.subr.bf16.mxu0 %v3750_v40 }
  0x5d   : > { %3405 = vmatpush3.bf16.msra.mxu0 %v3751_v46 }
  0x5e   : > { %3406 = vmatprep.subr.bf16.mxu0 %v3756_v55  ;;  %v1131_v55 = vshrl.u32 %v4156_v35, 16 }
  0x61   : > { %3407 = vmatpush3.bf16.msra.mxu0 %v3757_v57  ;;  %v4165_v57 = vrot.slane %v1144_v31, 11  ;;  %v3049_v31 = vrot.slane %v1131_v55, 11  ;;  %v2224_v55 = vld [vmem:[#allocation2 + $0x40] sm:$0x11] }
  0x62   : > { %3408 = vmatprep.subr.bf16.mxu0 %v3760_v61 }
  0x65   : > { %3409 = vmatpush3.bf16.msra.mxu0 %v3761_v62 }
  0x66   : > { %3446 = vmatprep.subr.bf16.mxu0 %v3766_v3  ;;  %v4174_v3 = vld [vmem:[#allocation2 + $0x34] sm:$0x8] }
  0xf8   : > { %v3504_v48 = vpop.f32.mrb[0].mxu1 }
  0xf9   : > { %v466_v49 = vpop.f32.mrb[1].mxu1 }
  0xfa   : > { %v3505_v13 = vpop.f32.mrb[2].mxu1 }
  0xfb   : > { %v469_v6 = vpop.f32.mrb[3].mxu1 }
 0x10a   : > { %v3540_v52 = vpop.f32.mrb[0].mxu0 }
 0x10b   : > { %v3630_v53 = vadd.f32 %v3540_v52, %v3504_v48  ;;  %v940_v14 = vpop.f32.mrb[1].mxu0  ;;  %v3508_v15 = vpop.f32.mrb[4].mxu1 }
 0x10c   : > { %v3631_v8 = vadd.f32 %v940_v14, %v466_v49  ;;  %v3541_v9 = vpop.f32.mrb[2].mxu0  ;;  %v482_v18 = vpop.f32.mrb[5].mxu1 }
 0x10d   : > { %v985_v10 = vadd.f32 %v3630_v53, %v3038_v7  ;;  %v3632_v11 = vadd.f32 %v3541_v9, %v3505_v13  ;;  %v943_v12 = vpop.f32.mrb[3].mxu0  ;;  %v3509_v21 = vpop.f32.mrb[6].mxu1  ;;  %v2259_v13 = vshll.u32 %v4162_v50, 16 }
 0x10e   : > { %v983_v16 = vadd.f32 %v3631_v8, %v3038_v7  ;;  %v3633_v17 = vadd.f32 %v943_v12, %v469_v6  ;;  %v485_v56 = vpop.f32.mrb[7].mxu1  ;;  %v1559_v8 = vshrl.u32 %v4167_v58, 16 }
 0x10f   : > { %v993_v19 = vmax.f32 %v985_v10, 0.0  ;;  %v986_v20 = vadd.f32 %v3632_v11, %v3038_v7 }
 0x110   : > { %v991_v22 = vmax.f32 %v983_v16, 0.0  ;;  %v984_v42 = vadd.f32 %v3633_v17, %v3038_v7  ;;  %v1093_v16 = vld [vmem:[#allocation2 + $0x60] sm:$0x88]  ;;  %v1572_v17 = vshrl.u32 %v4174_v3, 16  ;;  %v1546_v3 = vld [vmem:[#allocation2 + $0x4c] sm:$0x8] }
 0x111   : > { %v3283_v43 = vpack.c.bf16 %v993_v19, %v993_v19  ;;  %v994_v1 = vmax.f32 %v986_v20, 0.0  ;;  %v3771_v19 = vld [vmem:[%s4641_s2 + $0x148] sm:$0xff]   ;;  %v1157_v26 = vshrl.u32 %v1093_v16, 16 }
 0x112   : > { %v3281_v23 = vpack.c.bf16 %v991_v22, %v991_v22  ;;  %v992_v24 = vmax.f32 %v984_v42, 0.0 }
 0x113   : > { %1059 = vst [vmem:[#allocation2 + $0x50] sm:$0xf] %v3283_v43  ;;  %1067 = vst [vmem:[#allocation2 + $0x3c] sm:$0xf] %v3283_v43  ;;  %v3284_v45 = vpack.c.bf16 %v994_v1, %v994_v1  ;;  %v3544_v27 = vpop.f32.mrb[4].mxu0  ;;  %v4260_v0 = vrot.slane %v1157_v26, 11 }
 0x114   : > { %1057 = vst [vmem:[#allocation2 + $0x20] sm:$0xf] %v3281_v23  ;;  %1065 = vst [vmem:[#allocation2 + $0xc] sm:$0xf] %v3281_v23  ;;  %v3282_v25 = vpack.c.bf16 %v992_v24, %v992_v24  ;;  %v3634_v29 = vadd.f32 %v3544_v27, %v3508_v15  ;;  %v956_v30 = vpop.f32.mrb[5].mxu0  ;;  %v3768_v15 = vld [vmem:[%s4641_s2 + $0x100] sm:$0xff]  }
 0x115   : > { %1060 = vst [vmem:[#allocation2 + $0x68] sm:$0xf] %v3284_v45  ;;  %1068 = vst [vmem:[#allocation2 + $0x54] sm:$0xf] %v3284_v45  ;;  %v3635_v32 = vadd.f32 %v956_v30, %v482_v18  ;;  %v3545_v33 = vpop.f32.mrb[6].mxu0 }
 0x116   : > { %1058 = vst [vmem:[#allocation2 + $0x38] sm:$0xf] %v3282_v25  ;;  %1066 = vst [vmem:[#allocation2 + $0x24] sm:$0xf] %v3282_v25  ;;  %v989_v36 = vadd.f32 %v3634_v29, %v3038_v7  ;;  %v3636_v37 = vadd.f32 %v3545_v33, %v3509_v21  ;;  %v959_v38 = vpop.f32.mrb[7].mxu0  ;;  %v3772_v29 = vld [vmem:[%s4641_s2 + $0x108] sm:$0xff]  }
 0x117   : > { %v987_v40 = vadd.f32 %v3635_v32, %v3038_v7  ;;  %v3637_v46 = vadd.f32 %v959_v38, %v485_v56  ;;  %v1095_v24 = vld [vmem:[#allocation2 + $0x78] sm:$0x88]  ;;  %v1097_v27 = vld [vmem:[#allocation2 + $0x90] sm:$0x88]  ;;  %v1099_v38 = vld [vmem:[#allocation2 + $0xa8] sm:$0x88] }
 0x118   : > { %v997_v51 = vmax.f32 %v989_v36, 0.0  ;;  %v990_v54 = vadd.f32 %v3636_v37, %v3038_v7  ;;  %v3775_v36 = vld [vmem:[%s4641_s2 + $0x150] sm:$0xff]   ;;  %v1170_v37 = vshrl.u32 %v1095_v24, 16  ;;  %v1183_v50 = vshrl.u32 %v1097_v27, 16  ;;  %v2226_v26 = vld [vmem:[#allocation2 + $0x58] sm:$0x11] }
 0x119   : > { %v995_v59 = vmax.f32 %v987_v40, 0.0  ;;  %v988_v61 = vadd.f32 %v3637_v46, %v3038_v7  ;;  %v4241_v40 = vrot.slane %v2259_v13, 5  ;;  %v3780_v27 = vld [vmem:[%s4641_s2 + $0x118] sm:$0xff]  }
 0x11a   : > { %v3287_v4 = vpack.c.bf16 %v997_v51, %v997_v51  ;;  %v998_v5 = vmax.f32 %v990_v54, 0.0  ;;  %v4245_v51 = vrot.slane %v1559_v8, 11  ;;  %v4247_v54 = vrot.slane %v1572_v17, 11  ;;  %v3779_v17 = vld [vmem:[%s4641_s2 + $0x158] sm:$0xff]  }
 0x11b   : > { %v4169_v62 = vld [vmem:[#allocation2 + $0x8] sm:$0xff]  ;;  %v3285_v6 = vpack.c.bf16 %v995_v59, %v995_v59  ;;  %v996_v52 = vmax.f32 %v988_v61, 0.0  ;;  %v4186_v9 = vpop.f32.mrb[8].mxu0 }
 0x11c   : > { %v4176_v48 = vld [vmem:[#allocation2 + $0x50] sm:$0xff]  ;;  %v1110_v49 = vshrl.u32 %v4169_v62, 16  ;;  %1063 = vst [vmem:[#allocation2 + $0xb0] sm:$0xf] %v3287_v4  ;;  %1071 = vst [vmem:[#allocation2 + $0x9c] sm:$0xf] %v3287_v4  ;;  %v3288_v10 = vpack.c.bf16 %v998_v5, %v998_v5 }
 0x11d   : > { %v4180_v53 = vld [vmem:[#allocation2 + $0x20] sm:$0xff]  ;;  %v4182_v7 = vld [vmem:[#allocation2 + $0x38] sm:$0xff]  ;;  %v1149_v14 = vshrl.u32 %v4176_v48, 16  ;;  %1061 = vst [vmem:[#allocation2 + $0x80] sm:$0xf] %v3285_v6  ;;  %v3286_v18 = vpack.c.bf16 %v996_v52, %v996_v52  ;;  %v1113_v21 = vshll.u32 %v4169_v62, 16 }
 0x11e   : > { %v3142_v11 = vcombine.high %v4169_v62, %v4180_v53  ;;  %v3141_v12 = vcombine.low %v4169_v62, %v4180_v53  ;;  %1069 = vst [vmem:[#allocation2 + $0x6c] sm:$0xf] %v3285_v6  ;;  %v1112_v20 = vrot.slane %v1110_v49, 7  ;;  %v1123_v22 = vshrl.u32 %v4180_v53, 16  ;;  %v4203_v42 = vpop.f32.mrb[9].mxu0  ;;  %v3778_v52 = vld [vmem:[%s4642_s3 + $0x8] sm:$0xff]  }
 0x11f   : > { %1072 = vst [vmem:[#allocation2 + $0xb4] sm:$0xf] %v3288_v10  ;;  %v3144_v56 = vcombine.high %v4182_v7, %v4176_v48  ;;  %v1136_v43 = vshrl.u32 %v4182_v7, 16  ;;  %v1151_v1 = vrot.slane %v1149_v14, 7  ;;  %v1152_v23 = vshll.u32 %v4176_v48, 16  ;;  %v4211_v44 = vpop.f32.mrb[10].mxu0 }
 0x120   : > { %2016 = vmatprep.mubr.bf16.mxu0 %v3142_v11  ;;  %1062 = vst [vmem:[#allocation2 + $0x98] sm:$0xf] %v3286_v18  ;;  %1070 = vst [vmem:[#allocation2 + $0x84] sm:$0xf] %v3286_v18  ;;  %v1115_v45 = vor.u32 %v1113_v21, %v1112_v20  ;;  %v1125_v2 = vrot.slane %v1123_v22, 7  ;;  %v1126_v25 = vshll.u32 %v4180_v53, 16 }
 0x121   : > { %2017 = vmatmul.mubr.bf16.vlgmr.msra.gmra.mrb[16].mxu0 %v3141_v12  ;;  %v4218_v28 = vpop.f32.mrb[11].mxu0  ;;  %v1138_v32 = vrot.slane %v1136_v43, 7  ;;  %v1139_v33 = vshll.u32 %v4182_v7, 16  ;;  %v1154_v34 = vor.u32 %v1152_v23, %v1151_v1  ;;  %v1196_v6 = vshrl.u32 %v1099_v38, 16  ;;  %v3783_v53 = vld [vmem:[%s4641_s2 + $0x160] sm:$0xff]  }
 0x122   : > { %2024 = vmatprep.mubr.bf16.mxu0 %v3144_v56  ;;  %3447 = vmatpush3.bf16.msra.mxu0 %v3768_v15  ;;  %v1128_v35 = vor.u32 %v1126_v25, %v1125_v2  ;;  %v1116_v58 = vsel %vm4225_vm6, %v4160_v47, %v1115_v45  ;;  %v3052_v10 = vrot.slane %v1170_v37, 11  ;;  %v2273_v12 = vshll.u32 %v2224_v55, 16 }
 0x123   : > { %3448 = vmatprep.subr.bf16.mxu0 %v3771_v19  ;;  %v1141_v46 = vor.u32 %v1139_v33, %v1138_v32  ;;  %v4258_v61 = vsel %vm4225_vm6, %v4165_v57, %v1154_v34  ;;  %v3777_v57 = vld [vmem:[%s4641_s2 + $0x110] sm:$0xff]   ;;  %v4289_v20 = vrot.slane %v1183_v50, 11  ;;  %v1585_v56 = vshrl.u32 %v1546_v3, 16 }
 0x124   : > { %v1129_v59 = vsel %vm4225_vm6, %v4171_v63, %v1128_v35  ;;  %v3143_v63 = vcombine.low %v4182_v7, %v4176_v48  ;;  %v2252_v32 = vrot.slane %v1123_v22, 4  ;;  %v2255_v34 = vrot.slane %v1126_v25, 5  ;;  %v1552_v22 = vld [vmem:[#allocation2 + $0x94] sm:$0x8] }
 0x125   : > { %v3055_v4 = vcombine.low %v1116_v58, %v1129_v59  ;;  %v3056_v5 = vcombine.high %v1116_v58, %v1129_v59  ;;  %v4264_v13 = vsel %vm4225_vm6, %v3049_v31, %v1141_v46  ;;  %v4266_v47 = vld [vmem:[#allocation2 + $0x68] sm:$0xff]  ;;  %v4302_v31 = vrot.slane %v1196_v6, 11 }
 0x126   : > { %3449 = vmatpush3.bf16.msra.mxu0 %v3772_v29  ;;  %v1162_v8 = vshrl.u32 %v4266_v47, 16  ;;  %v4277_v11 = vld [vmem:[#allocation2 + $0xb0] sm:$0xff]  ;;  %v3058_v15 = vcombine.high %v4264_v13, %v4258_v61  ;;  %v1165_v18 = vshll.u32 %v4266_v47, 16  ;;  %v4316_v38 = vrot.slane %v2273_v12, 5  ;;  %v1548_v12 = vld [vmem:[#allocation2 + $0x64] sm:$0x8] }
 0x127   : > { %3450 = vmatprep.subr.bf16.mxu0 %v3775_v36  ;;  %1400 = vmatprep.mubr.bf16.mxu1 %v3056_v5  ;;  %v4281_v16 = vld [vmem:[#allocation2 + $0x80] sm:$0xff]  ;;  %v4287_v19 = vld [vmem:[#allocation2 + $0x98] sm:$0xff]  ;;  %v1201_v2 = vshrl.u32 %v4277_v11, 16  ;;  %v2238_v25 = vrot.slane %v1110_v49, 4  ;;  %v2241_v46 = vrot.slane %v1113_v21, 5  ;;  %v2287_v50 = vshll.u32 %v2226_v26, 16 }
 0x128   : > { %1401 = vmatmul.mubr.bf16.vlgmr.msra.gmra.mrb[8].mxu1 %v3055_v4  ;;  %v3146_v1 = vcombine.high %v4266_v47, %v4281_v16  ;;  %v1164_v24 = vrot.slane %v1162_v8, 7  ;;  %v1175_v45 = vshrl.u32 %v4281_v16, 16  ;;  %v1188_v29 = vshrl.u32 %v4287_v19, 16  ;;  %v4333_v4 = vld [vmem:[#allocation2 + $0x24] sm:$0xf] }
 0x129   : > { %2025 = vmatmul.mubr.bf16.gmra.mrb[20].mxu0 %v3143_v63  ;;  %3559 = vmatpush3.bf16.msra.mxu1 %v4150_v41  ;;  %v3781_v41 = vld [vmem:[%s4642_s3 + $0x10] sm:$0xff]   ;;  %v1178_v37 = vshll.u32 %v4281_v16, 16  ;;  %v4325_v55 = vrot.slane %v1585_v56, 11  ;;  %v1203_v3 = vrot.slane %v1201_v2, 7  ;;  %v4335_v5 = vld [vmem:[#allocation2 + $0x3c] sm:$0xf]  ;;  %v3057_v62 = vcombine.low %v4264_v13, %v4258_v61 }
 0x12a   : > { %1408 = vmatprep.mubr.bf16.mxu1 %v3058_v15  ;;  %2032 = vmatprep.mubr.bf16.mxu0 %v3146_v1  ;;  %v1167_v35 = vor.u32 %v1165_v18, %v1164_v24  ;;  %v1177_v36 = vrot.slane %v1175_v45, 7  ;;  %v1190_v59 = vrot.slane %v1188_v29, 7  ;;  %v1204_v49 = vshll.u32 %v4277_v11, 16  ;;  %v3785_v61 = vld [vmem:[%s4641_s2 + $0x120] sm:$0xff]   ;;  %v4355_v15 = vld [vmem:[#allocation2 + $0xcc] sm:$0xf] }
 0x12b   : > { %3451 = vmatpush3.bf16.msra.mxu0 %v3777_v57  ;;  %3560 = vmatprep.subr.bf16.mxu1 %v3778_v52  ;;  %v2256_v21 = vor.u32 %v2255_v34, %v2252_v32  ;;  %v1624_v6 = vshrl.u32 %v1552_v22, 16  ;;  %v1191_v13 = vshll.u32 %v4287_v19, 16  ;;  %v2242_v56 = vor.u32 %v2241_v46, %v2238_v25  ;;  %v3789_v32 = vld [vmem:[%s4642_s3 + $0x20] sm:$0xff]   ;;  %v4381_v22 = vld [vmem:[#allocation2 + $0xac] sm:$0x8] }
 0x12c   : > { %3452 = vmatprep.subr.bf16.mxu0 %v3779_v17  ;;  %v1180_v58 = vor.u32 %v1178_v37, %v1177_v36  ;;  %v4343_v63 = vsel %vm4225_vm6, %v4260_v0, %v1167_v35  ;;  %v3787_v17 = vld [vmem:[%s4641_s2 + $0x168] sm:$0xff]   ;;  %v1564_v1 = vshrl.u32 %v4333_v4, 16  ;;  %v1577_v24 = vshrl.u32 %v4335_v5, 16  ;;  %v1550_v46 = vld [vmem:[#allocation2 + $0x7c] sm:$0x8] }
 0x12d   : > { %3561 = vmatpush3.bf16.msra.mxu1 %v3778_v52  ;;  %v3145_v52 = vcombine.low %v4266_v47, %v4281_v16  ;;  %v3148_v26 = vcombine.high %v4287_v19, %v4277_v11  ;;  %v1193_v34 = vor.u32 %v1191_v13, %v1190_v59  ;;  %v1206_v35 = vor.u32 %v1204_v49, %v1203_v3 }
 0x12e   : > { %3562 = vmatprep.subr.bf16.mxu1 %v3781_v41  ;;  %v4347_v57 = vsel %vm4225_vm6, %v3052_v10, %v1180_v58  ;;  %v3786_v10 = vld [vmem:[%s4642_s3 + $0x18] sm:$0xff]   ;;  %v4379_v36 = vrot.slane %v2287_v50, 5  ;;  %v1598_v25 = vshrl.u32 %v1548_v12, 16  ;;  %v4383_v58 = vrot.slane %v1624_v6, 11  ;;  %v3791_v6 = vld [vmem:[%s4641_s2 + $0x170] sm:$0xff]  }
 0x12f   : > { %3453 = vmatpush3.bf16.msra.mxu0 %v3780_v27  ;;  %v3060_v0 = vcombine.high %v4343_v63, %v4347_v57  ;;  %v3788_v27 = vld [vmem:[%s4641_s2 + $0x128] sm:$0xff]   ;;  %v2266_v59 = vrot.slane %v1136_v43, 4  ;;  %v2269_v50 = vrot.slane %v1139_v33, 5  ;;  %v2280_v3 = vrot.slane %v1149_v14, 4  ;;  %v4411_v12 = vld [vmem:[#allocation2 + $0x70] sm:$0x11] }
 0x130   : > { %3454 = vmatprep.subr.bf16.mxu0 %v3783_v53  ;;  %1409 = vmatmul.mubr.bf16.gmra.mrb[12].mxu1 %v3057_v62  ;;  %v2257_v53 = vrot.slane %v2256_v21, 4  ;;  %v4394_v21 = vld [vmem:[#allocation2 + $0x6c] sm:$0xf]  ;;  %v1579_v43 = vrot.slane %v1577_v24, 7  ;;  %v1637_v7 = vshrl.u32 %v4381_v22, 16  ;;  %v4403_v14 = vsel %vm4225_vm6, %v4289_v20, %v1193_v34  ;;  %v3792_v24 = vld [vmem:[%s4641_s2 + $0x130] sm:$0xff]  }
 0x131   : > { %2033 = vmatmul.mubr.bf16.gmra.mrb[24].mxu0 %v3145_v52  ;;  %3563 = vmatpush3.bf16.msra.mxu1 %v3781_v41  ;;  %v2283_v41 = vrot.slane %v1152_v23, 5  ;;  %v2243_v52 = vrot.slane %v2242_v56, 4  ;;  %v4408_v48 = vsel %vm4225_vm6, %v4302_v31, %v1206_v35  ;;  %v1580_v23 = vshll.u32 %v4335_v5, 16  ;;  %v4421_v56 = vld [vmem:[#allocation2 + $0x54] sm:$0xf] }
 0x132   : > { %1416 = vmatprep.mubr.bf16.mxu1 %v3060_v0  ;;  %2040 = vmatprep.mubr.bf16.mxu0 %v3148_v26  ;;  %v1611_v33 = vshrl.u32 %v1550_v46, 16  ;;  %v3147_v0 = vcombine.low %v4287_v19, %v4277_v11  ;;  %v1567_v20 = vshll.u32 %v4333_v4, 16  ;;  %v1603_v31 = vshrl.u32 %v4394_v21, 16  ;;  %v4433_v35 = vld [vmem:[#allocation2 + $0x9c] sm:$0xf] }
 0x133   : > { %3455 = vmatpush3.bf16.msra.mxu0 %v3785_v61  ;;  %3564 = vmatprep.subr.bf16.mxu1 %v3786_v10  ;;  %v1566_v61 = vrot.slane %v1564_v1, 7  ;;  %v4424_v1 = vld [vmem:[#allocation2 + $0x84] sm:$0xf]  ;;  %v2270_v26 = vor.u32 %v2269_v50, %v2266_v59  ;;  %v4431_v34 = vrot.slane %v1598_v25, 11  ;;  %v3062_v46 = vcombine.high %v4403_v14, %v4408_v48 }
 0x134   : > { %3456 = vmatprep.subr.bf16.mxu0 %v3787_v17  ;;  %v4418_v17 = vsel %vm3933_vm3, %v2257_v53, %v4241_v40  ;;  %v2284_v40 = vor.u32 %v2283_v41, %v2280_v3  ;;  %v4435_v53 = vld [vmem:[#allocation2 + $0xc4] sm:$0x8]  ;;  %v1582_v59 = vor.u32 %v1580_v23, %v1579_v43  ;;  %v1590_v3 = vshrl.u32 %v4421_v56, 16  ;;  %v2230_v41 = vld [vmem:[#allocation2 + $0x88] sm:$0x11]  ;;  %v3795_v23 = vld [vmem:[%s4641_s2 + $0x138] sm:$0xff]  }
 0x135   : > { %3565 = vmatpush3.bf16.msra.mxu1 %v3786_v10  ;;  %v3059_v10 = vcombine.low %v4343_v63, %v4347_v57  ;;  %v4442_v63 = vsel %vm3933_vm3, %v2243_v52, %v4239_v39  ;;  %v3793_v57 = vld [vmem:[%s4642_s3 + $0x28] sm:$0xff]   ;;  %v1569_v25 = vor.u32 %v1567_v20, %v1566_v61  ;;  %v1616_v39 = vshrl.u32 %v4424_v1, 16 }
 0x136   : > { %3566 = vmatprep.subr.bf16.mxu1 %v3789_v32  ;;  %v3226_v50 = vcombine.high %v4442_v63, %v4418_v17  ;;  %v1605_v52 = vrot.slane %v1603_v31, 7  ;;  %v4455_v62 = vrot.slane %v1611_v33, 11  ;;  %v1629_v61 = vshrl.u32 %v4433_v35, 16 }
 0x137   : > { %3457 = vmatpush3.bf16.msra.mxu0 %v3788_v27  ;;  %v3794_v27 = vld [vmem:[%s4641_s2 + $0x178] sm:$0xff]   ;;  %v1650_v43 = vshrl.u32 %v4435_v53, 16  ;;  %v2271_v20 = vrot.slane %v2270_v26, 4  ;;  %v2308_v33 = vrot.slane %v1175_v45, 4  ;;  %v2311_v31 = vrot.slane %v1178_v37, 5 }
 0x138   : > { %3458 = vmatprep.subr.bf16.mxu0 %v3791_v6  ;;  %1417 = vmatmul.mubr.bf16.gmra.mrb[16].mxu1 %v3059_v10  ;;  %v2301_v6 = vshll.u32 %v4411_v12, 16  ;;  %v1570_v10 = vsel %vm4225_vm6, %v4245_v51, %v1569_v25  ;;  %v2315_v26 = vshll.u32 %v2230_v41, 16  ;;  %v2294_v45 = vrot.slane %v1162_v8, 4  ;;  %v4480_v37 = vld [vmem:[#allocation2 + $0xb4] sm:$0xf]  ;;  %v3797_v8 = vld [vmem:[%s4642_s3 + $0x38] sm:$0xff]  }
 0x139   : > { %2041 = vmatmul.mubr.bf16.gmra.mrb[28].mxu0 %v3147_v0  ;;  %3567 = vmatpush3.bf16.msra.mxu1 %v3789_v32  ;;  %v3796_v0 = vld [vmem:[%s4642_s3 + $0x30] sm:$0xff]   ;;  %v2285_v32 = vrot.slane %v2284_v40, 4  ;;  %v1592_v40 = vrot.slane %v1590_v3, 7  ;;  %v2297_v16 = vrot.slane %v1165_v18, 5  ;;  %v3061_v51 = vcombine.low %v4403_v14, %v4408_v48 }
 0x13a   : > { %1424 = vmatprep.mubr.bf16.mxu1 %v3062_v46  ;;  %2540 = vmatprep.mubr.bf16.mxu0 %v3226_v50  ;;  %v1606_v46 = vshll.u32 %v4394_v21, 16  ;;  %v1618_v50 = vrot.slane %v1616_v39, 7  ;;  %v1631_v25 = vrot.slane %v1629_v61, 7  ;;  %v1619_v18 = vshll.u32 %v4424_v1, 16 }
 0x13b   : > { %3459 = vmatpush3.bf16.msra.mxu0 %v3792_v24  ;;  %3568 = vmatprep.subr.bf16.mxu1 %v3793_v57  ;;  %v1583_v24 = vsel %vm4225_vm6, %v4247_v54, %v1582_v59  ;;  %v2276_v59 = vsel %vm3933_vm3, %v2271_v20, %v4316_v38  ;;  %v2290_v47 = vsel %vm3933_vm3, %v2285_v32, %v4379_v36  ;;  %v2317_v3 = vrot.slane %v2315_v26, 5 }
 0x13c   : > { %3460 = vmatprep.subr.bf16.mxu0 %v3794_v27  ;;  %v1593_v27 = vshll.u32 %v4421_v56, 16  ;;  %v1608_v54 = vor.u32 %v1606_v46, %v1605_v52  ;;  %v2312_v14 = vor.u32 %v2311_v31, %v2308_v33  ;;  %v3097_v48 = vcombine.low %v1570_v10, %v1583_v24  ;;  %v2234_v33 = vld [vmem:[#allocation2 + $0xb8] sm:$0x11]  ;;  %v2232_v31 = vld [vmem:[#allocation2 + $0xa0] sm:$0x11] }
 0x13d   : > { %3569 = vmatpush3.bf16.msra.mxu1 %v3793_v57  ;;  %v1632_v57 = vshll.u32 %v4433_v35, 16  ;;  %v1642_v39 = vshrl.u32 %v4480_v37, 16  ;;  %v3225_v38 = vcombine.low %v4442_v63, %v4418_v17  ;;  %v1621_v52 = vor.u32 %v1619_v18, %v1618_v50  ;;  %v3800_v18 = vld [vmem:[%s4642_s3 + $0x50] sm:$0xff]  }
 0x13e   : > { %3570 = vmatprep.subr.bf16.mxu1 %v3796_v0  ;;  %v1595_v41 = vor.u32 %v1593_v27, %v1592_v40  ;;  %v2298_v36 = vor.u32 %v2297_v16, %v2294_v45  ;;  %v3228_v61 = vcombine.high %v2276_v59, %v2290_v47  ;;  %v1609_v20 = vsel %vm4225_vm6, %v4431_v34, %v1608_v54 }
 0x13f   : > { %3461 = vmatpush3.bf16.msra.mxu0 %v3795_v23  ;;  %v3798_v23 = vld [vmem:[%s4642_s3 + $0x40] sm:$0xff]   ;;  %v1634_v32 = vor.u32 %v1632_v57, %v1631_v25  ;;  %v2322_v17 = vrot.slane %v1188_v29, 4  ;;  %v2313_v63 = vrot.slane %v2312_v14, 4  ;;  %v2336_v10 = vrot.slane %v1201_v2, 4 }
 0x140   : > { %1425 = vmatmul.mubr.bf16.gmra.mrb[20].mxu1 %v3061_v51  ;;  %v2339_v24 = vrot.slane %v1204_v49, 5  ;;  %v3095_v34 = vrot.slane %v1637_v7, 11  ;;  %v1644_v46 = vrot.slane %v1642_v39, 7  ;;  %v4650_v29 = vshrl.u32 %v4355_v15, 16 }
 0x141   : > { %3571 = vmatpush3.bf16.msra.mxu1 %v3796_v0  ;;  %3574 = vmatprep.mubr.bf16.mxu1 %v3097_v48  ;;  %v2325_v0 = vrot.slane %v1191_v13, 5  ;;  %v1658_v40 = vshll.u32 %v4355_v15, 16  ;;  %v1596_v19 = vsel %vm4225_vm6, %v4325_v55, %v1595_v41  ;;  %v1622_v2 = vsel %vm4225_vm6, %v4455_v62, %v1621_v52  ;;  %v3799_v62 = vld [vmem:[%s4642_s3 + $0x48] sm:$0xff]  }
 0x142   : > { %2541 = vmatmul.mubr.bf16.vlgmr.msra.gmra.mrb[32].mxu0 %v3225_v38  ;;  %3572 = vmatprep.subr.bf16.mxu1 %v3797_v8  ;;  %v1657_v26 = vrot.slane %v4650_v29, 7  ;;  %v2299_v11 = vrot.slane %v2298_v36, 4  ;;  %v2303_v49 = vrot.slane %v2301_v6, 5  ;;  %v3098_v13 = vcombine.low %v1596_v19, %v1609_v20  ;;  %v3802_v38 = vld [vmem:[%s4642_s3 + $0x58] sm:$0xff]   ;;  %v3803_v36 = vld [vmem:[%s4642_s3 + $0x60] sm:$0xff]  }
 0x143   : > { %2548 = vmatprep.mubr.bf16.mxu0 %v3228_v61  ;;  %v1645_v22 = vshll.u32 %v4480_v37, 16  ;;  %v2329_v7 = vshll.u32 %v2232_v31, 16  ;;  %v2343_v50 = vshll.u32 %v2234_v33, 16  ;;  %v1635_v45 = vsel %vm4225_vm6, %v4383_v58, %v1634_v32  ;;  %v3804_v61 = vld [vmem:[%s4642_s3 + $0x68] sm:$0xff]   ;;  %v2583_v20 = vld [vmem:[#allocation2 + $0x3c] sm:$0xf] }
 0x144   : > { %v2318_v55 = vsel %vm3933_vm3, %v2313_v63, %v2317_v3  ;;  %v2326_v12 = vor.u32 %v2325_v0, %v2322_v17  ;;  %v2340_v6 = vor.u32 %v2339_v24, %v2336_v10  ;;  %v3099_v16 = vcombine.low %v1622_v2, %v1635_v45  ;;  %v3806_v17 = vld [vmem:[%s4642_s3 + $0x78] sm:$0xff]   ;;  %v2582_v24 = vld [vmem:[#allocation2 + $0x2c] sm:$0x1] }
 0x145   : > { %3573 = vmatpush3.bf16.msra.mxu1 %v3797_v8  ;;  %v1647_v51 = vor.u32 %v1645_v22, %v1644_v46  ;;  %v3096_v27 = vrot.slane %v1650_v43, 11  ;;  %v1660_v54 = vor.u32 %v1658_v40, %v1657_v26  ;;  %v3227_v25 = vcombine.low %v2276_v59, %v2290_v47  ;;  %v2584_v26 = vld [vmem:[#allocation2 + $0x44] sm:$0x1] }
 0x146   : > { %3582 = vmatprep.subr.bf16.mxu1 %v3798_v23  ;;  %v2304_v58 = vsel %vm3933_vm3, %v2299_v11, %v2303_v49  ;;  %v2327_v14 = vrot.slane %v2326_v12, 4  ;;  %v2331_v48 = vrot.slane %v2329_v7, 5  ;;  %v2341_v57 = vrot.slane %v2340_v6, 4  ;;  %v3810_v11 = vld [vmem:[%s4642_s3 + $0x88] sm:$0xff]   ;;  %v4589_v12 = vpop.f32.mrb[12].mxu0 }
 0x147   : > { %v3230_v8 = vcombine.high %v2304_v58, %v2318_v55  ;;  %v2345_v53 = vrot.slane %v2343_v50, 5  ;;  %v1648_v43 = vsel %vm4225_vm6, %v3095_v34, %v1647_v51  ;;  %v1661_v59 = vsel %vm4225_vm6, %v3096_v27, %v1660_v54  ;;  %v3808_v34 = vld [vmem:[%s4642_s3 + $0x80] sm:$0xff]   ;;  %v2587_v51 = vld [vmem:[#allocation2 + $0x6c] sm:$0xf] }
 0x148   : > { %3575 = vmatmul.mubr.bf16.vlgmr.msra.gmra.mrb[24].mxu1 %v3098_v13  ;;  %v3100_v47 = vcombine.low %v1648_v43, %v1661_v59  ;;  %v2332_v3 = vsel %vm3933_vm3, %v2327_v14, %v2331_v48  ;;  %v3181_v41 = vcombine.low %v4333_v4, %v4335_v5  ;;  %v3229_v52 = vcombine.low %v2304_v58, %v2318_v55  ;;  %v2581_v4 = vld [vmem:[#allocation2 + $0x24] sm:$0xf]  ;;  %v3805_v5 = vld [vmem:[%s4642_s3 + $0x70] sm:$0xff]   ;;  %v3815_v43 = vld [vmem:[%s4642_s3 + $0xa8] sm:$0xff]  }
 0x149   : > { %3583 = vmatpush3.bf16.msra.mxu1 %v3798_v23  ;;  %3578 = vmatprep.mubr.bf16.mxu1 %v3099_v16  ;;  %v2346_v39 = vsel %vm3933_vm3, %v2341_v57, %v2345_v53  ;;  %v2598_v32 = vshrl.u32 %v2581_v4, 16  ;;  %v2601_v33 = vshll.u32 %v2581_v4, 16  ;;  %v2612_v63 = vshrl.u32 %v2583_v20, 16  ;;  %v4591_v16 = vpop.f32.mrb[13].mxu0  ;;  %v3814_v54 = vld [vmem:[%s4642_s3 + $0xa0] sm:$0xff]  }
 0x14a   : > { %2549 = vmatmul.mubr.bf16.gmra.mrb[36].mxu0 %v3227_v25  ;;  %3584 = vmatprep.subr.bf16.mxu1 %v3799_v62  ;;  %v3232_v30 = vcombine.high %v2332_v3, %v2346_v39  ;;  %v3231_v23 = vcombine.low %v2332_v3, %v2346_v39  ;;  %v2615_v31 = vshll.u32 %v2583_v20, 16  ;;  %v2607_v19 = vshll.u32 %v2582_v24, 16  ;;  %v4593_v27 = vpop.f32.mrb[14].mxu0  ;;  %v2585_v25 = vld [vmem:[#allocation2 + $0x54] sm:$0xf] }
 0x14b   : > { %2556 = vmatprep.mubr.bf16.mxu0 %v3230_v8  ;;  %v2600_v0 = vrot.slane %v2598_v32, 4  ;;  %v2603_v10 = vrot.slane %v2601_v33, 5  ;;  %v2614_v46 = vrot.slane %v2612_v63, 4  ;;  %v3182_v2 = vcombine.low %v4421_v56, %v4394_v21  ;;  %v3812_v21 = vld [vmem:[%s4642_s3 + $0x90] sm:$0xff]  }
 0x14c   : > { %v2617_v29 = vrot.slane %v2615_v31, 5  ;;  %v2621_v13 = vshll.u32 %v2584_v26, 16  ;;  %v3183_v22 = vcombine.low %v4424_v1, %v4433_v35  ;;  %v2609_v50 = vrot.slane %v2607_v19, 5  ;;  %v3813_v35 = vld [vmem:[%s4642_s3 + $0x98] sm:$0xff]   ;;  %v3816_v20 = vld [vmem:[%s4642_s3 + $0xb0] sm:$0xff]  }
 0x14d   : > { %3585 = vmatpush3.bf16.msra.mxu1 %v3799_v62  ;;  %v2604_v40 = vor.u32 %v2603_v10, %v2600_v0  ;;  %v3184_v62 = vcombine.low %v4480_v37, %v4355_v15  ;;  %v2589_v15 = vld [vmem:[#allocation2 + $0x84] sm:$0xf]  ;;  %v4595_v37 = vpop.f32.mrb[15].mxu0  ;;  %v2640_v58 = vshrl.u32 %v2587_v51, 16  ;;  %v2643_v8 = vshll.u32 %v2587_v51, 16  ;;  %v3817_v19 = vld [vmem:[%s4642_s3 + $0xb8] sm:$0xff]  }
 0x14e   : > { %3586 = vmatprep.subr.bf16.mxu1 %v3800_v18  ;;  %v2618_v49 = vor.u32 %v2617_v29, %v2614_v46  ;;  %v2623_v45 = vrot.slane %v2621_v13, 5  ;;  %v2654_v14 = vshrl.u32 %v2589_v15, 16  ;;  %v2657_v48 = vshll.u32 %v2589_v15, 16  ;;  %v2592_v10 = vld [vmem:[#allocation2 + $0xa4] sm:$0x1] }
 0x14f   : > { %v2605_v7 = vrot.slane %v2604_v40, 4  ;;  %v2626_v57 = vshrl.u32 %v2585_v25, 16  ;;  %v2629_v53 = vshll.u32 %v2585_v25, 16  ;;  %v2642_v3 = vrot.slane %v2640_v58, 4 }
 0x150   : > { %3579 = vmatmul.mubr.bf16.gmra.mrb[28].mxu1 %v3100_v47  ;;  %v2619_v56 = vrot.slane %v2618_v49, 4  ;;  %v2645_v39 = vrot.slane %v2643_v8, 5 }
 0x151   : > { %3587 = vmatpush3.bf16.msra.mxu1 %v3800_v18  ;;  %3598 = vmatprep.mubr.bf16.mxu1 %v3181_v41  ;;  %v2610_v55 = vsel %vm3933_vm3, %v2605_v7, %v2609_v50  ;;  %v2591_v18 = vld [vmem:[#allocation2 + $0x9c] sm:$0xf]  ;;  %v2588_v41 = vld [vmem:[#allocation2 + $0x74] sm:$0x1]  ;;  %v2631_v4 = vrot.slane %v2629_v53, 5 }
 0x152   : > { %2557 = vmatmul.mubr.bf16.gmra.mrb[40].mxu0 %v3229_v52  ;;  %3588 = vmatprep.subr.bf16.mxu1 %v3802_v38  ;;  %v2624_v1 = vsel %vm3933_vm3, %v2619_v56, %v2623_v45  ;;  %v2668_v59 = vshrl.u32 %v2591_v18, 16  ;;  %v2671_v47 = vshll.u32 %v2591_v18, 16  ;;  %v2656_v52 = vrot.slane %v2654_v14, 4  ;;  %v2594_v50 = vld [vmem:[#allocation2 + $0xbc] sm:$0x1] }
 0x153   : > { %2564 = vmatprep.mubr.bf16.mxu0 %v3232_v30  ;;  %v3265_v6 = vcombine.low %v2610_v55, %v2624_v1  ;;  %v2659_v30 = vrot.slane %v2657_v48, 5  ;;  %v2646_v31 = vor.u32 %v2645_v39, %v2642_v3  ;;  %v2649_v0 = vshll.u32 %v2588_v41, 16 }
 0x154   : > { %v2670_v32 = vrot.slane %v2668_v59, 4  ;;  %v2673_v33 = vrot.slane %v2671_v47, 5  ;;  %v2691_v15 = vshll.u32 %v2594_v50, 16 }
 0x155   : > { %3589 = vmatpush3.bf16.msra.mxu1 %v3802_v38  ;;  %v2595_v38 = vld [vmem:[#allocation2 + $0xcc] sm:$0xf]  ;;  %v2660_v46 = vor.u32 %v2659_v30, %v2656_v52  ;;  %v2651_v7 = vrot.slane %v2649_v0, 5 }
 0x156   : > { %3590 = vmatprep.subr.bf16.mxu1 %v3803_v36  ;;  %v2699_v63 = vshll.u32 %v2595_v38, 16  ;;  %v2693_v53 = vrot.slane %v2691_v15, 5 }
 0x157   : > { %v2661_v45 = vrot.slane %v2660_v46, 4 }
 0x158   : > { %v2701_v13 = vrot.slane %v2699_v63, 5 }
 0x159   : > { %3591 = vmatpush3.bf16.msra.mxu1 %v3803_v36  ;;  %v2593_v36 = vld [vmem:[#allocation2 + $0xb4] sm:$0xf] }
 0x15a   : > { %2565 = vmatmul.mubr.bf16.gmra.mrb[44].mxu0 %v3231_v23  ;;  %3592 = vmatprep.subr.bf16.mxu1 %v3804_v61  ;;  %v2628_v23 = vrot.slane %v2626_v57, 4  ;;  %v2682_v24 = vshrl.u32 %v2593_v36, 16 }
 0x15c   : > { %v2632_v26 = vor.u32 %v2631_v4, %v2628_v23 }
 0x15d   : > { %3593 = vmatpush3.bf16.msra.mxu1 %v3804_v61  ;;  %v2586_v61 = vld [vmem:[#allocation2 + $0x5c] sm:$0x1] }
 0x15e   : > { %3594 = vmatprep.subr.bf16.mxu1 %v3805_v5  ;;  %v2635_v40 = vshll.u32 %v2586_v61, 16  ;;  %v2633_v1 = vrot.slane %v2632_v26, 4 }
 0x161   : > { %3595 = vmatpush3.bf16.msra.mxu1 %v3805_v5  ;;  %v2590_v5 = vld [vmem:[#allocation2 + $0x8c] sm:$0x1] }
 0x162   : > { %3596 = vmatprep.subr.bf16.mxu1 %v3806_v17  ;;  %v2663_v29 = vshll.u32 %v2590_v5, 16 }
 0x164   : > { %v2665_v55 = vrot.slane %v2663_v29, 5 }
 0x165   : > { %3597 = vmatpush3.bf16.msra.mxu1 %v3806_v17  ;;  %v2696_v17 = vshrl.u32 %v2595_v38, 16 }
 0x166   : > { %3606 = vmatprep.subr.bf16.mxu1 %v3808_v34  ;;  %v2666_v18 = vsel %vm3933_vm3, %v2661_v45, %v2665_v55 }
 0x167   : > { %v2698_v49 = vrot.slane %v2696_v17, 4 }
 0x168   : > { %3599 = vmatmul.mubr.bf16.vlgmr.msra.gmra.mrb[24].mxu1 %v3182_v2  ;;  %v2674_v2 = vor.u32 %v2673_v33, %v2670_v32 }
 0x169   : > { %3602 = vmatprep.mubr.bf16.mxu1 %v3183_v22  ;;  %3607 = vmatpush3.bf16.msra.mxu1 %v3808_v34  ;;  %v2685_v34 = vshll.u32 %v2593_v36, 16  ;;  %v2647_v22 = vrot.slane %v2646_v31, 4  ;;  %v2702_v58 = vor.u32 %v2701_v13, %v2698_v49 }
 0x16a   : > { %3608 = vmatprep.subr.bf16.mxu1 %v3810_v11 }
 0x16b   : > { %v2687_v56 = vrot.slane %v2685_v34, 5  ;;  %v2703_v47 = vrot.slane %v2702_v58, 4 }
 0x16d   : > { %3609 = vmatpush3.bf16.msra.mxu1 %v3810_v11  ;;  %v2677_v11 = vshll.u32 %v2592_v10, 16 }
 0x16e   : > { %3610 = vmatprep.subr.bf16.mxu1 %v3812_v21 }
 0x16f   : > { %v2679_v51 = vrot.slane %v2677_v11, 5 }
 0x170   : > { %3603 = vmatmul.mubr.bf16.gmra.mrb[28].mxu1 %v3184_v62  ;;  %v2596_v62 = vld [vmem:[#allocation2 + $0xd4] sm:$0x1] }
 0x171   : > { %3611 = vmatpush3.bf16.msra.mxu1 %v3812_v21  ;;  %3622 = vmatprep.mubr.bf16.mxu1 %v3265_v6  ;;  %v2684_v21 = vrot.slane %v2682_v24, 4  ;;  %v2675_v6 = vrot.slane %v2674_v2, 4  ;;  %v2705_v8 = vshll.u32 %v2596_v62, 16 }
 0x172   : > { %3612 = vmatprep.subr.bf16.mxu1 %v3813_v35 }
 0x173   : > { %v2688_v25 = vor.u32 %v2687_v56, %v2684_v21  ;;  %v2680_v57 = vsel %vm3933_vm3, %v2675_v6, %v2679_v51  ;;  %v2707_v3 = vrot.slane %v2705_v8, 5 }
 0x175   : > { %3613 = vmatpush3.bf16.msra.mxu1 %v3813_v35  ;;  %v2637_v35 = vrot.slane %v2635_v40, 5  ;;  %v2689_v59 = vrot.slane %v2688_v25, 4  ;;  %v2708_v38 = vsel %vm3933_vm3, %v2703_v47, %v2707_v3 }
 0x176   : > { %3614 = vmatprep.subr.bf16.mxu1 %v3814_v54 }
 0x177   : > { %v2638_v14 = vsel %vm3933_vm3, %v2633_v1, %v2637_v35  ;;  %v2694_v39 = vsel %vm3933_vm3, %v2689_v59, %v2693_v53 }
 0x178   : > { %v3268_v41 = vcombine.low %v2694_v39, %v2708_v38 }
 0x179   : > { %3615 = vmatpush3.bf16.msra.mxu1 %v3814_v54  ;;  %v2652_v54 = vsel %vm3933_vm3, %v2647_v22, %v2651_v7 }
 0x17a   : > { %3616 = vmatprep.subr.bf16.mxu1 %v3815_v43  ;;  %v3266_v48 = vcombine.low %v2638_v14, %v2652_v54 }
 0x17d   : > { %3617 = vmatpush3.bf16.msra.mxu1 %v3815_v43  ;;  %v3267_v43 = vcombine.low %v2666_v18, %v2680_v57 }
 0x17e   : > { %3618 = vmatprep.subr.bf16.mxu1 %v3816_v20 }
 0x181   : > { %3619 = vmatpush3.bf16.msra.mxu1 %v3816_v20 }
 0x182   : > { %3620 = vmatprep.subr.bf16.mxu1 %v3817_v19 }
 0x185   : > { %3621 = vmatpush3.bf16.msra.mxu1 %v3817_v19 }
 0x188   : > { %3623 = vmatmul.mubr.bf16.vlgmr.msra.gmra.mrb[24].mxu1 %v3266_v48 }
 0x189   : > { %3626 = vmatprep.mubr.bf16.mxu1 %v3267_v43 }
 0x190   : > { %3627 = vmatmul.mubr.bf16.gmra.mrb[28].mxu1 %v3268_v41 }
 0x1f4   : > { %v3410_v52 = vpop.f32.mrb[16].mxu0 }
 0x1f5   : > { %v3411_v30 = vpop.f32.mrb[17].mxu0 }
 0x1f6   : > { %v3412_v36 = vadd.f32 %v3411_v30, %v3410_v52  ;;  %v3413_v61 = vpop.f32.mrb[18].mxu0 }
 0x1f7   : > { %v3414_v23 = vpop.f32.mrb[19].mxu0 }
 0x1f8   : > { %v3415_v4 = vadd.f32 %v3414_v23, %v3413_v61 }
 0x1fb   : > { %v3352_v5 = vpop.f32.mrb[8].mxu1 }
 0x1fc   : > { %v3416_v20 = vpop.f32.mrb[20].mxu0  ;;  %v3353_v32 = vpop.f32.mrb[9].mxu1 }
 0x1fd   : > { %v3417_v33 = vpop.f32.mrb[21].mxu0  ;;  %v3354_v17 = vadd.f32 %v3353_v32, %v3352_v5  ;;  %v3355_v63 = vpop.f32.mrb[10].mxu1 }
 0x1fe   : > { %v3418_v31 = vadd.f32 %v3417_v33, %v3416_v20  ;;  %v3419_v0 = vpop.f32.mrb[22].mxu0  ;;  %v3356_v10 = vpop.f32.mrb[11].mxu1 }
 0x1ff   : > { %v3420_v24 = vpop.f32.mrb[23].mxu0  ;;  %v1512_v60 = vadd.f32 %v3354_v17, %v4203_v42  ;;  %v3357_v34 = vadd.f32 %v3356_v10, %v3355_v63 }
 0x200   : > { %v3421_v46 = vadd.f32 %v3420_v24, %v3419_v0 }
 0x201   : > { %v1515_v29 = vadd.f32 %v3357_v34, %v4218_v28  ;;  %v3643_v26 = vadd.f32 %v3412_v36, %v1512_v60 }
 0x203   : > { %v3358_v40 = vpop.f32.mrb[12].mxu1  ;;  %v3651_v2 = vadd.f32 %v3415_v4, %v1515_v29 }
 0x204   : > { %v3422_v19 = vpop.f32.mrb[24].mxu0  ;;  %v3359_v11 = vpop.f32.mrb[13].mxu1 }
 0x205   : > { %v3423_v49 = vpop.f32.mrb[25].mxu0  ;;  %v3360_v13 = vadd.f32 %v3359_v11, %v3358_v40  ;;  %v3361_v22 = vpop.f32.mrb[14].mxu1 }
 0x206   : > { %v3424_v7 = vadd.f32 %v3423_v49, %v3422_v19  ;;  %v3425_v50 = vpop.f32.mrb[26].mxu0  ;;  %v3362_v21 = vpop.f32.mrb[15].mxu1 }
 0x207   : > { %v3426_v56 = vpop.f32.mrb[27].mxu0  ;;  %v1520_v45 = vadd.f32 %v4186_v9, %v3360_v13  ;;  %v3363_v55 = vadd.f32 %v3362_v21, %v3361_v22 }
 0x208   : > { %v3427_v42 = vadd.f32 %v3426_v56, %v3425_v50 }
 0x209   : > { %v1523_v62 = vadd.f32 %v4211_v44, %v3363_v55  ;;  %v3639_v1 = vadd.f32 %v3418_v31, %v1520_v45  ;;  %v3277_v45 = vld [vmem:[%s4644_s5 + $0x1] ss:$0 sm:$0xff] }
 0x20b   : > { %v3364_v28 = vpop.f32.mrb[16].mxu1  ;;  %v3647_v6 = vadd.f32 %v3421_v46, %v1523_v62 }
 0x20c   : > { %v3428_v35 = vpop.f32.mrb[28].mxu0  ;;  %v3365_v51 = vpop.f32.mrb[17].mxu1 }
 0x20d   : > { %v3429_v15 = vpop.f32.mrb[29].mxu0  ;;  %v3366_v54 = vadd.f32 %v3365_v51, %v3364_v28  ;;  %v3367_v25 = vpop.f32.mrb[18].mxu1 }
 0x20e   : > { %v3430_v58 = vadd.f32 %v3429_v15, %v3428_v35  ;;  %v3431_v8 = vpop.f32.mrb[30].mxu0  ;;  %v3368_v18 = vpop.f32.mrb[19].mxu1 }
 0x20f   : > { %v3432_v14 = vpop.f32.mrb[31].mxu0  ;;  %v1528_v48 = vadd.f32 %v3366_v54, %v4591_v16  ;;  %v3369_v57 = vadd.f32 %v3368_v18, %v3367_v25 }
 0x210   : > { %v3433_v9 = vadd.f32 %v3432_v14, %v3431_v8 }
 0x211   : > { %v1531_v53 = vadd.f32 %v3369_v57, %v4595_v37  ;;  %v3659_v43 = vadd.f32 %v3424_v7, %v1528_v48 }
 0x213   : > { %v3370_v44 = vpop.f32.mrb[20].mxu1  ;;  %v3667_v59 = vadd.f32 %v3427_v42, %v1531_v53 }
 0x214   : > { %v3371_v47 = vpop.f32.mrb[21].mxu1 }
 0x215   : > { %v3372_v3 = vadd.f32 %v3371_v47, %v3370_v44  ;;  %v3462_v39 = vpop.f32.mrb[32].mxu0  ;;  %v3373_v38 = vpop.f32.mrb[22].mxu1 }
 0x216   : > { %v3463_v41 = vpop.f32.mrb[33].mxu0  ;;  %v3374_v52 = vpop.f32.mrb[23].mxu1 }
 0x217   : > { %v1536_v30 = vadd.f32 %v4589_v12, %v3372_v3  ;;  %v3464_v36 = vadd.f32 %v3463_v41, %v3462_v39  ;;  %v3375_v61 = vadd.f32 %v3374_v52, %v3373_v38  ;;  %v3465_v23 = vpop.f32.mrb[34].mxu0 }
 0x218   : > { %v3466_v4 = vpop.f32.mrb[35].mxu0 }
 0x219   : > { %v1539_v16 = vadd.f32 %v4593_v27, %v3375_v61  ;;  %v3467_v5 = vadd.f32 %v3466_v4, %v3465_v23  ;;  %v3644_v20 = vadd.f32 %v3643_v26, %v3464_v36  ;;  %v3655_v37 = vadd.f32 %v3430_v58, %v1536_v30 }
 0x21b   : > { %v3652_v32 = vadd.f32 %v3651_v2, %v3467_v5  ;;  %v3663_v33 = vadd.f32 %v3433_v9, %v1539_v16 }
 0x21d   : > { %v3468_v17 = vpop.f32.mrb[36].mxu0 }
 0x21e   : > { %v3469_v63 = vpop.f32.mrb[37].mxu0 }
 0x21f   : > { %v3470_v31 = vadd.f32 %v3469_v63, %v3468_v17  ;;  %v3471_v0 = vpop.f32.mrb[38].mxu0 }
 0x220   : > { %v3472_v10 = vpop.f32.mrb[39].mxu0 }
 0x221   : > { %v3473_v24 = vadd.f32 %v3472_v10, %v3471_v0  ;;  %v3640_v60 = vadd.f32 %v3639_v1, %v3470_v31 }
 0x223   : > { %v3648_v34 = vadd.f32 %v3647_v6, %v3473_v24 }
 0x225   : > { %v3474_v12 = vpop.f32.mrb[40].mxu0 }
 0x226   : > { %v3475_v46 = vpop.f32.mrb[41].mxu0 }
 0x227   : > { %v3476_v29 = vadd.f32 %v3475_v46, %v3474_v12  ;;  %v3477_v40 = vpop.f32.mrb[42].mxu0 }
 0x228   : > { %v3478_v19 = vpop.f32.mrb[43].mxu0 }
 0x229   : > { %v3479_v11 = vadd.f32 %v3478_v19, %v3477_v40  ;;  %v3660_v27 = vadd.f32 %v3659_v43, %v3476_v29 }
 0x22b   : > { %v3668_v49 = vadd.f32 %v3667_v59, %v3479_v11 }
 0x22d   : > { %v3480_v26 = vpop.f32.mrb[44].mxu0 }
 0x22e   : > { %v3481_v13 = vpop.f32.mrb[45].mxu0 }
 0x22f   : > { %v3482_v2 = vadd.f32 %v3481_v13, %v3480_v26  ;;  %v3483_v22 = vpop.f32.mrb[46].mxu0 }
 0x230   : > { %v3484_v7 = vpop.f32.mrb[47].mxu0 }
 0x231   : > { %v3485_v50 = vadd.f32 %v3484_v7, %v3483_v22  ;;  %v3656_v21 = vadd.f32 %v3655_v37, %v3482_v2 }
 0x233   : > { %v3664_v56 = vadd.f32 %v3663_v33, %v3485_v50 }
 0x25b   : > { %v3624_v55 = vpop.f32.mrb[24].mxu1 }
 0x25c   : > { %v3641_v42 = vadd.f32 %v3640_v60, %v3624_v55  ;;  %v2824_v62 = vpop.f32.mrb[25].mxu1 }
 0x25d   : > { %v3645_v1 = vadd.f32 %v3644_v20, %v2824_v62  ;;  %v3625_v28 = vpop.f32.mrb[26].mxu1 }
 0x25e   : > { %v2869_v35 = vadd.f32 %v3641_v42, %v3277_v45  ;;  %v3649_v6 = vadd.f32 %v3648_v34, %v3625_v28  ;;  %v2827_v51 = vpop.f32.mrb[27].mxu1 }
 0x25f   : > { %v2867_v15 = vadd.f32 %v3645_v1, %v3277_v45  ;;  %v3653_v54 = vadd.f32 %v3652_v32, %v2827_v51 }
 0x260   : > { %v2870_v25 = vadd.f32 %v3649_v6, %v3277_v45  ;;  %v2877_v8 = vmax.f32 %v2869_v35, 0.0 }
 0x261   : > { %v2868_v58 = vadd.f32 %v3653_v54, %v3277_v45  ;;  %v2875_v14 = vmax.f32 %v2867_v15, 0.0 }
 0x262   : > { %v2878_v18 = vmax.f32 %v2870_v25, 0.0 }
 0x263   : > { %v2876_v48 = vmax.f32 %v2868_v58, 0.0  ;;  %v3628_v57 = vpop.f32.mrb[28].mxu1 }
 0x264   : > { %v3297_v9 = vpack.c.bf16 %v2878_v18, %v2877_v8  ;;  %v3657_v53 = vadd.f32 %v3656_v21, %v3628_v57  ;;  %v2840_v43 = vpop.f32.mrb[29].mxu1 }
 0x265   : > { %v3292_v44 = vpack.c.bf16 %v2876_v48, %v2875_v14  ;;  %v3661_v59 = vadd.f32 %v3660_v27, %v2840_v43  ;;  %v3629_v47 = vpop.f32.mrb[30].mxu1 }
 0x266   : > { %3309 = vst [vmem:[%s251_s24 + $0x8] sm:$0xff] %v3297_v9   ;;  %v2873_v3 = vadd.f32 %v3657_v53, %v3277_v45  ;;  %v3665_v39 = vadd.f32 %v3664_v56, %v3629_v47  ;;  %v2843_v38 = vpop.f32.mrb[31].mxu1 }
 0x267   : > { %3293 = vst [vmem:[%s251_s24] sm:$0xff] %v3292_v44   ;;  %v2871_v41 = vadd.f32 %v3661_v59, %v3277_v45  ;;  %v3669_v52 = vadd.f32 %v3668_v49, %v2843_v38 }
 0x268   : > { %v2874_v30 = vadd.f32 %v3665_v39, %v3277_v45  ;;  %v2881_v61 = vmax.f32 %v2873_v3, 0.0 }
 0x269   : > { %v2872_v36 = vadd.f32 %v3669_v52, %v3277_v45  ;;  %v2879_v4 = vmax.f32 %v2871_v41, 0.0 }
 0x26a   : > { %v2882_v23 = vmax.f32 %v2874_v30, 0.0 }
 0x26b   : > { %v2880_v16 = vmax.f32 %v2872_v36, 0.0 }
 0x26c   : > { %v3307_v5 = vpack.c.bf16 %v2882_v23, %v2881_v61 }
 0x26d   : > { %v3302_v20 = vpack.c.bf16 %v2880_v16, %v2879_v4 }
 0x26e   : > { %3311 = vst [vmem:[%s251_s24 + $0x18] sm:$0xff] %v3307_v5  }
 0x26f   : > { %3310 = vst [vmem:[%s251_s24 + $0x10] sm:$0xff] %v3302_v20  }
 0x270 PF: > { %s16_s21 = sadd.s32 1, %s3824_s21  }
 0x271   : > { %p13_p4 = scmp.ge.s32.totalorder %s16_s21, 4  }
 0x273   :  { %15 = sbr.rel (!%p13_p4) target bundleno = 1 (0x1), region = 84 }

</bundles_post_ra>
